<compile_context>
chip_gen: v7x
topology: tpu7x:2x2x1
jax: 0.10.0
libtpu: 0.0.40
codegen_flags: <defaults>
</compile_context>

<pallas_src>
import functools

import jax
import jax.numpy as jnp
from jax import lax
from jax.experimental import pallas as pl
from jax.experimental.pallas import tpu as pltpu

EPS = 1e-5  # BatchNorm2d default eps


# ----------------------------------------------------------------------------
# Fused OCRNet kernel: one grid step == one batch element, everything in VMEM.
# Activation layout inside the kernel: (channels, HW)  == flattened NCHW.
# ----------------------------------------------------------------------------
def _ocrnet_kernel(
    xpad_ref, mask_l_ref, mask_r_ref,
    w_sor1_ref, b_sor1_ref, w_sor2_ref, b_sor2_ref,
    w_pix_ref, b_pix_ref,
    w_q1_ref, b_q1_ref, w_q2_ref, b_q2_ref,
    w_k1_ref, b_k1_ref, w_k2_ref, b_k2_ref,
    w_val_ref, b_val_ref,
    w_up_ref, b_up_ref,
    w_aug_a_ref, w_aug_b_ref, b_aug_ref,
    w_seg_ref, b_seg_ref,
    soft_ref, seg_ref, aug_ref,
    *, H, W, P, Q, pad_top):
  f32 = jnp.float32
  HW = H * W
  NT = (((1,), (1,)), ((), ()))  # contract the last (lane) dim of both operands

  def nt(a, b):
    return lax.dot_general(a, b, NT, preferred_element_type=f32)

  def nn(a, b):
    return jnp.dot(a, b, preferred_element_type=f32)

  def relu(t):
    return jnp.maximum(t, 0.0)

  # -------- soft object regions: conv1x1(+bias)+BN+ReLU -> conv1x1(+bias) ----
  x_c = xpad_ref[0, pl.ds(pad_top, HW), :]                     # (HW, Cin)
  h1 = relu(nt(w_sor1_ref[...], x_c) + b_sor1_ref[...])        # (Cin, HW)
  soft_t = nn(w_sor2_ref[...], h1) + b_sor2_ref[...]           # (K, HW)
  soft_ref[0] = soft_t                                         # NCHW layout

  # -------- pixel representations: 3x3 conv (pad=1) + BN + ReLU --------------
  # Nine shifted row windows of the H-zero-padded input accumulated in VMEM;
  # the dx = -1 / +1 taps are masked at the left/right image borders.
  acc = jnp.zeros((P, HW), f32)
  for dx in range(3):
    part = jnp.zeros((P, HW), f32)
    for dy in range(3):
      start = pad_top + (dy - 1) * W + (dx - 1)                # static offset
      win = xpad_ref[0, pl.ds(start, HW), :]                   # (HW, Cin)
      part = part + nt(w_pix_ref[dy * 3 + dx], win)            # (P, HW)
    if dx == 0:
      part = part * mask_l_ref[...]
    elif dx == 2:
      part = part * mask_r_ref[...]
    acc = acc + part
  pix_t = relu(acc + b_pix_ref[...])                           # (P, HW)

  # -------- object region representations ------------------------------------
  # softmax over the spatial dim (lanes) then soft-weighted pooling of pix.
  s = soft_t - jnp.max(soft_t, axis=1, keepdims=True)
  e = jnp.exp(s)
  p_soft = e * pl.reciprocal(jnp.sum(e, axis=1, keepdims=True), approx=True)
  obj = nt(p_soft, pix_t)                                      # (K, P)
  obj_t = nt(pix_t, p_soft)                                    # (P, K)

  # -------- query / key / value projections ----------------------------------
  q = relu(nn(w_q1_ref[...], pix_t) + b_q1_ref[...])           # (Q, HW)
  q = relu(nn(w_q2_ref[...], q) + b_q2_ref[...])               # (Q, HW)
  k = relu(nn(obj, w_k1_ref[...]) + b_k1_ref[...])             # (K, Q)
  k = relu(nn(k, w_k2_ref[...]) + b_k2_ref[...])               # (K, Q)
  v = relu(nn(w_val_ref[...], obj_t) + b_val_ref[...])         # (Q, K)

  # -------- pixel/region relation (softmax over classes) + OCR aggregation ---
  # logits kept (K, HW): pixels stay lane-dense, the per-pixel softmax over the
  # K classes reduces across 8 sublanes only.
  logits = nn(k, q) * (float(Q) ** -0.5)                       # (K, HW)
  logits = logits - jnp.max(logits, axis=0, keepdims=True)
  el = jnp.exp(logits)
  rel = el * pl.reciprocal(jnp.sum(el, axis=0, keepdims=True), approx=True)
  ocr = nn(v, rel)                                             # (Q, HW)

  # -------- ocr_up -> (concat-free) augmented rep -> segmentation head -------
  ocr_up = relu(nn(w_up_ref[...], ocr) + b_up_ref[...])        # (P, HW)
  aug = relu(nn(w_aug_a_ref[...], ocr_up)
             + nn(w_aug_b_ref[...], pix_t) + b_aug_ref[...])   # (P, HW)
  # TODO(synk): nn.Dropout2d(0.05) is identity at inference; training-mode
  # dropout is not implemented.
  seg = nn(w_seg_ref[...], aug) + b_seg_ref[...]               # (K, HW)

  aug_ref[0] = aug
  seg_ref[0] = seg


# ----------------------------------------------------------------------------
# Parameter construction (deterministic, synthetic). BN init follows
# OCRNet.init_weights(): gamma=1, beta=0; running stats mean=0, var=1 (eval).
# conv weights stored as (Cin, Cout); the 3x3 conv weight as (9*Cin, Cout)
# with (dy, dx, c) patch order.
# ----------------------------------------------------------------------------
def _make_layer(key, cin, cout, conv_bias, with_bn):
  kw, kb = jax.random.split(key)
  w = jax.random.normal(kw, (cin, cout), jnp.float32) * 0.1
  b = (jax.random.normal(kb, (cout,), jnp.float32) * 0.1
       if conv_bias else jnp.zeros((cout,), jnp.float32))
  if with_bn:
    gamma = jnp.ones((cout,), jnp.float32)
    beta = jnp.zeros((cout,), jnp.float32)
    mean = jnp.zeros((cout,), jnp.float32)
    var = jnp.ones((cout,), jnp.float32)
    scale = gamma / jnp.sqrt(var + EPS)
    shift = (b - mean) * scale + beta
  else:
    scale = jnp.ones((cout,), jnp.float32)
    shift = b
  return {"w": w, "scale": scale, "shift": shift}


def init_params(key, cin, num_classes, P, Q):
  ks = jax.random.split(key, 11)
  return {
      "sor1":   _make_layer(ks[0], cin, cin, conv_bias=True, with_bn=True),
      "sor2":   _make_layer(ks[1], cin, num_classes, conv_bias=True, with_bn=False),
      "pixrep": _make_layer(ks[2], 9 * cin, P, conv_bias=True, with_bn=True),
      "q1":     _make_layer(ks[3], P, Q, conv_bias=False, with_bn=True),
      "q2":     _make_layer(ks[4], Q, Q, conv_bias=False, with_bn=True),
      "k1":     _make_layer(ks[5], P, Q, conv_bias=False, with_bn=True),
      "k2":     _make_layer(ks[6], Q, Q, conv_bias=False, with_bn=True),
      "value":  _make_layer(ks[7], P, Q, conv_bias=False, with_bn=True),
      "ocr_up": _make_layer(ks[8], Q, P, conv_bias=False, with_bn=True),
      "aug":    _make_layer(ks[9], 2 * P, P, conv_bias=False, with_bn=True),
      "seg":    _make_layer(ks[10], P, num_classes, conv_bias=True, with_bn=False),
  }


# ----------------------------------------------------------------------------
# Wrapper: fold BN scales into weights, orient weights so all in-kernel
# contractions are NN/NT matmuls, and launch the fused kernel.
# ----------------------------------------------------------------------------
def _fold_row(layer):
  # y = x @ (W * scale) + shift[None, :]
  return layer["w"] * layer["scale"][None, :], layer["shift"].reshape(1, -1)


def _fold_col(layer):
  # y^T = (scale * W^T) @ x^T + shift[:, None]
  return layer["w"].T * layer["scale"][:, None], layer["shift"].reshape(-1, 1)


def _resident_spec(arr):
  zero = (0,) * arr.ndim
  return pl.BlockSpec(arr.shape, lambda b: zero)


def ocrnet_forward(x_nchw, params, *, num_classes, P, Q):
  B, cin, H, W = x_nchw.shape
  HW = H * W
  pad_top = W + 8                       # >= W + 1 zero rows above the image
  pad_bot = W + 8
  rows = pad_top + HW + pad_bot

  # Single layout transform of the (tiny) raw input: rows-major pixels with
  # zero rows above/below so every 3x3 tap is a plain row-offset window.
  x_rows = jnp.transpose(x_nchw, (0, 2, 3, 1)).reshape(B, HW, cin)
  x_pad = jnp.pad(x_rows.astype(jnp.float32),
                  ((0, 0), (pad_top, pad_bot), (0, 0)))

  # Horizontal-padding masks for the dx = -1 / +1 taps (lane-shaped, 2 vregs).
  col = jnp.arange(HW, dtype=jnp.int32) % W
  mask_l = (col >= 1).astype(jnp.float32).reshape(1, HW)
  mask_r = (col <= W - 2).astype(jnp.float32).reshape(1, HW)

  w_sor1, b_sor1 = _fold_col(params["sor1"])      # (Cin, Cin), (Cin, 1)
  w_sor2, b_sor2 = _fold_col(params["sor2"])      # (K, Cin),   (K, 1)
  pr = params["pixrep"]
  w_pix = (pr["w"] * pr["scale"][None, :]).reshape(9, cin, P).transpose(0, 2, 1)
  b_pix = pr["shift"].reshape(P, 1)               # (9, P, Cin), (P, 1)
  w_q1, b_q1 = _fold_col(params["q1"])            # (Q, P), (Q, 1)
  w_q2, b_q2 = _fold_col(params["q2"])            # (Q, Q), (Q, 1)
  w_k1, b_k1 = _fold_row(params["k1"])            # (P, Q), (1, Q)
  w_k2, b_k2 = _fold_row(params["k2"])            # (Q, Q), (1, Q)
  w_val, b_val = _fold_col(params["value"])       # (Q, P), (Q, 1)
  w_up, b_up = _fold_col(params["ocr_up"])        # (P, Q), (P, 1)
  ag = params["aug"]
  w_aug_full = ag["w"] * ag["scale"][None, :]     # (2P, P)
  w_aug_a = w_aug_full[:P].T                      # (P, P)  acts on ocr_up
  w_aug_b = w_aug_full[P:].T                      # (P, P)  acts on pix
  b_aug = ag["shift"].reshape(P, 1)
  w_seg, b_seg = _fold_col(params["seg"])         # (K, P), (K, 1)

  weights = [w_sor1, b_sor1, w_sor2, b_sor2, w_pix, b_pix,
             w_q1, b_q1, w_q2, b_q2, w_k1, b_k1, w_k2, b_k2,
             w_val, b_val, w_up, b_up, w_aug_a, w_aug_b, b_aug,
             w_seg, b_seg]

  in_specs = ([pl.BlockSpec((1, rows, cin), lambda b: (b, 0, 0)),
               _resident_spec(mask_l), _resident_spec(mask_r)]
              + [_resident_spec(w) for w in weights])

  out_shape = (
      jax.ShapeDtypeStruct((B, num_classes, HW), jnp.float32),
      jax.ShapeDtypeStruct((B, num_classes, HW), jnp.float32),
      jax.ShapeDtypeStruct((B, P, HW), jnp.float32),
  )
  out_specs = (
      pl.BlockSpec((1, num_classes, HW), lambda b: (b, 0, 0)),
      pl.BlockSpec((1, num_classes, HW), lambda b: (b, 0, 0)),
      pl.BlockSpec((1, P, HW), lambda b: (b, 0, 0)),
  )

  kernel = functools.partial(_ocrnet_kernel, H=H, W=W, P=P, Q=Q,
                             pad_top=pad_top)

  soft_t, seg_t, aug_t = pl.pallas_call(
      kernel,
      out_shape=out_shape,
      grid=(B,),
      in_specs=in_specs,
      out_specs=out_specs,
      compiler_params=pltpu.CompilerParams(
          dimension_semantics=("parallel",)),
  )(x_pad, mask_l, mask_r, *weights)

  # Outputs are already in (C, HW) == NCHW layout: only reshapes here.
  return (soft_t.reshape(B, num_classes, H, W),
          seg_t.reshape(B, num_classes, H, W),
          aug_t.reshape(B, P, H, W))


if __name__ == "__main__":
  B, Cin, H, W = 2, 8, 16, 16
  NUM_CLASSES, PIX_REP, KEY_CH = 8, 32, 16

  key = jax.random.PRNGKey(0)
  kx, kp = jax.random.split(key)
  x = jax.random.normal(kx, (B, Cin, H, W), jnp.float32)
  params = init_params(kp, Cin, NUM_CLASSES, PIX_REP, KEY_CH)

  fwd = jax.jit(functools.partial(
      ocrnet_forward, num_classes=NUM_CLASSES, P=PIX_REP, Q=KEY_CH))
  soft_obj_reg, seg_classes, augmented_feats = fwd(x, params)
  jax.block_until_ready((soft_obj_reg, seg_classes, augmented_feats))

  assert soft_obj_reg.shape == (B, NUM_CLASSES, H, W)
  assert seg_classes.shape == (B, NUM_CLASSES, H, W)
  assert augmented_feats.shape == (B, PIX_REP, H, W)
  assert bool(jnp.all(jnp.isfinite(soft_obj_reg)))
  assert bool(jnp.all(jnp.isfinite(seg_classes)))
  assert bool(jnp.all(jnp.isfinite(augmented_feats)))
  print("KERNEL_OK")
</pallas_src>

<mosaic_0001>
module attributes {stable_mosaic.version = 11 : i64} {
  func.func @_ocrnet_kernel(%arg0: i32, %arg1: memref<1x304x8xf32, #tpu.memory_space<vmem>>, %arg2: memref<1x256xf32, #tpu.memory_space<vmem>>, %arg3: memref<1x256xf32, #tpu.memory_space<vmem>>, %arg4: memref<8x8xf32, #tpu.memory_space<vmem>>, %arg5: memref<8x1xf32, #tpu.memory_space<vmem>>, %arg6: memref<8x8xf32, #tpu.memory_space<vmem>>, %arg7: memref<8x1xf32, #tpu.memory_space<vmem>>, %arg8: memref<9x32x8xf32, #tpu.memory_space<vmem>>, %arg9: memref<32x1xf32, #tpu.memory_space<vmem>>, %arg10: memref<16x32xf32, #tpu.memory_space<vmem>>, %arg11: memref<16x1xf32, #tpu.memory_space<vmem>>, %arg12: memref<16x16xf32, #tpu.memory_space<vmem>>, %arg13: memref<16x1xf32, #tpu.memory_space<vmem>>, %arg14: memref<32x16xf32, #tpu.memory_space<vmem>>, %arg15: memref<1x16xf32, #tpu.memory_space<vmem>>, %arg16: memref<16x16xf32, #tpu.memory_space<vmem>>, %arg17: memref<1x16xf32, #tpu.memory_space<vmem>>, %arg18: memref<16x32xf32, #tpu.memory_space<vmem>>, %arg19: memref<16x1xf32, #tpu.memory_space<vmem>>, %arg20: memref<32x16xf32, #tpu.memory_space<vmem>>, %arg21: memref<32x1xf32, #tpu.memory_space<vmem>>, %arg22: memref<32x32xf32, #tpu.memory_space<vmem>>, %arg23: memref<32x32xf32, #tpu.memory_space<vmem>>, %arg24: memref<32x1xf32, #tpu.memory_space<vmem>>, %arg25: memref<8x32xf32, #tpu.memory_space<vmem>>, %arg26: memref<8x1xf32, #tpu.memory_space<vmem>>, %arg27: memref<1x8x256xf32, #tpu.memory_space<vmem>>, %arg28: memref<1x8x256xf32, #tpu.memory_space<vmem>>, %arg29: memref<1x32x256xf32, #tpu.memory_space<vmem>>) attributes {dimension_semantics = [#tpu.dimension_semantics<parallel>], iteration_bounds = array<i64: 2>, scalar_prefetch = 0 : i64, scratch_operands = 0 : i64, tpu.core_type = #tpu.core_type<tc>, window_params = [{transform_indices = @transform_0, window_bounds = array<i64: 1, 304, 8>}, {pipeline_mode = #tpu.pipeline_mode<synchronous>, transform_indices = @transform_1, window_bounds = array<i64: 1, 256>}, {pipeline_mode = #tpu.pipeline_mode<synchronous>, transform_indices = @transform_2, window_bounds = array<i64: 1, 256>}, {pipeline_mode = #tpu.pipeline_mode<synchronous>, transform_indices = @transform_3, window_bounds = array<i64: 8, 8>}, {pipeline_mode = #tpu.pipeline_mode<synchronous>, transform_indices = @transform_4, window_bounds = array<i64: 8, 1>}, {pipeline_mode = #tpu.pipeline_mode<synchronous>, transform_indices = @transform_5, window_bounds = array<i64: 8, 8>}, {pipeline_mode = #tpu.pipeline_mode<synchronous>, transform_indices = @transform_6, window_bounds = array<i64: 8, 1>}, {pipeline_mode = #tpu.pipeline_mode<synchronous>, transform_indices = @transform_7, window_bounds = array<i64: 9, 32, 8>}, {pipeline_mode = #tpu.pipeline_mode<synchronous>, transform_indices = @transform_8, window_bounds = array<i64: 32, 1>}, {pipeline_mode = #tpu.pipeline_mode<synchronous>, transform_indices = @transform_9, window_bounds = array<i64: 16, 32>}, {pipeline_mode = #tpu.pipeline_mode<synchronous>, transform_indices = @transform_10, window_bounds = array<i64: 16, 1>}, {pipeline_mode = #tpu.pipeline_mode<synchronous>, transform_indices = @transform_11, window_bounds = array<i64: 16, 16>}, {pipeline_mode = #tpu.pipeline_mode<synchronous>, transform_indices = @transform_12, window_bounds = array<i64: 16, 1>}, {pipeline_mode = #tpu.pipeline_mode<synchronous>, transform_indices = @transform_13, window_bounds = array<i64: 32, 16>}, {pipeline_mode = #tpu.pipeline_mode<synchronous>, transform_indices = @transform_14, window_bounds = array<i64: 1, 16>}, {pipeline_mode = #tpu.pipeline_mode<synchronous>, transform_indices = @transform_15, window_bounds = array<i64: 16, 16>}, {pipeline_mode = #tpu.pipeline_mode<synchronous>, transform_indices = @transform_16, window_bounds = array<i64: 1, 16>}, {pipeline_mode = #tpu.pipeline_mode<synchronous>, transform_indices = @transform_17, window_bounds = array<i64: 16, 32>}, {pipeline_mode = #tpu.pipeline_mode<synchronous>, transform_indices = @transform_18, window_bounds = array<i64: 16, 1>}, {pipeline_mode = #tpu.pipeline_mode<synchronous>, transform_indices = @transform_19, window_bounds = array<i64: 32, 16>}, {pipeline_mode = #tpu.pipeline_mode<synchronous>, transform_indices = @transform_20, window_bounds = array<i64: 32, 1>}, {pipeline_mode = #tpu.pipeline_mode<synchronous>, transform_indices = @transform_21, window_bounds = array<i64: 32, 32>}, {pipeline_mode = #tpu.pipeline_mode<synchronous>, transform_indices = @transform_22, window_bounds = array<i64: 32, 32>}, {pipeline_mode = #tpu.pipeline_mode<synchronous>, transform_indices = @transform_23, window_bounds = array<i64: 32, 1>}, {pipeline_mode = #tpu.pipeline_mode<synchronous>, transform_indices = @transform_24, window_bounds = array<i64: 8, 32>}, {pipeline_mode = #tpu.pipeline_mode<synchronous>, transform_indices = @transform_25, window_bounds = array<i64: 8, 1>}, {transform_indices = @transform_26, window_bounds = array<i64: 1, 8, 256>}, {transform_indices = @transform_27, window_bounds = array<i64: 1, 8, 256>}, {transform_indices = @transform_28, window_bounds = array<i64: 1, 32, 256>}]} {
    %c0 = arith.constant 0 : index
    %c24 = arith.constant 24 : index
    %c0_0 = arith.constant 0 : index
    %0 = vector.load %arg1[%c0, %c24, %c0_0] : memref<1x304x8xf32, #tpu.memory_space<vmem>>, vector<1x256x8xf32>
    %1 = vector.shape_cast %0 : vector<1x256x8xf32> to vector<256x8xf32>
    %c0_1 = arith.constant 0 : index
    %c0_2 = arith.constant 0 : index
    %2 = vector.load %arg4[%c0_1, %c0_2] : memref<8x8xf32, #tpu.memory_space<vmem>>, vector<8x8xf32>
    %cst = arith.constant dense<0.000000e+00> : vector<8x256xf32>
    %3 = tpu.matmul %2, %1, %cst {dimension_numbers = #tpu.dot_dimension_numbers<[1], [1], [0], [0], [0, 0, 1, 0], [], []>} : vector<8x8xf32>, vector<256x8xf32>, vector<8x256xf32> -> vector<8x256xf32>
    %c0_3 = arith.constant 0 : index
    %c0_4 = arith.constant 0 : index
    %4 = vector.load %arg5[%c0_3, %c0_4] : memref<8x1xf32, #tpu.memory_space<vmem>>, vector<8x1xf32>
    %5 = vector.broadcast %4 : vector<8x1xf32> to vector<8x256xf32>
    %6 = arith.addf %3, %5 : vector<8x256xf32>
    %cst_5 = arith.constant 0.000000e+00 : f32
    %7 = vector.broadcast %cst_5 : f32 to vector<8x256xf32>
    %8 = arith.maximumf %6, %7 : vector<8x256xf32>
    %c0_6 = arith.constant 0 : index
    %c0_7 = arith.constant 0 : index
    %9 = vector.load %arg6[%c0_6, %c0_7] : memref<8x8xf32, #tpu.memory_space<vmem>>, vector<8x8xf32>
    %cst_8 = arith.constant dense<0.000000e+00> : vector<8x256xf32>
    %10 = tpu.matmul %9, %8, %cst_8 {dimension_numbers = #tpu.dot_dimension_numbers<[1], [0], [0], [1], [0, 0, 1, 1], [], []>} : vector<8x8xf32>, vector<8x256xf32>, vector<8x256xf32> -> vector<8x256xf32>
    %c0_9 = arith.constant 0 : index
    %c0_10 = arith.constant 0 : index
    %11 = vector.load %arg7[%c0_9, %c0_10] : memref<8x1xf32, #tpu.memory_space<vmem>>, vector<8x1xf32>
    %12 = vector.broadcast %11 : vector<8x1xf32> to vector<8x256xf32>
    %13 = arith.addf %10, %12 : vector<8x256xf32>
    %c0_11 = arith.constant 0 : index
    %c0_12 = arith.constant 0 : index
    %c0_13 = arith.constant 0 : index
    %14 = vector.load %arg27[%c0_11, %c0_12, %c0_13] : memref<1x8x256xf32, #tpu.memory_space<vmem>>, vector<1x8x256xf32>
    %15 = vector.shape_cast %14 : vector<1x8x256xf32> to vector<8x256xf32>
    %16 = vector.shape_cast %13 : vector<8x256xf32> to vector<1x8x256xf32>
    tpu.vector_store %arg27[%c0_11, %c0_12, %c0_13], %16 {strides = array<i32>} : memref<1x8x256xf32, #tpu.memory_space<vmem>>, vector<1x8x256xf32>,
    %cst_14 = arith.constant 0.000000e+00 : f32
    %17 = vector.broadcast %cst_14 : f32 to vector<32x256xf32>
    %cst_15 = arith.constant 0.000000e+00 : f32
    %18 = vector.broadcast %cst_15 : f32 to vector<32x256xf32>
    %c0_16 = arith.constant 0 : index
    %c7 = arith.constant 7 : index
    %c0_17 = arith.constant 0 : index
    %19 = vector.load %arg1[%c0_16, %c7, %c0_17] : memref<1x304x8xf32, #tpu.memory_space<vmem>>, vector<1x256x8xf32>
    %20 = vector.shape_cast %19 : vector<1x256x8xf32> to vector<256x8xf32>
    %c0_18 = arith.constant 0 : index
    %c0_19 = arith.constant 0 : index
    %c0_20 = arith.constant 0 : index
    %21 = vector.load %arg8[%c0_18, %c0_19, %c0_20] : memref<9x32x8xf32, #tpu.memory_space<vmem>>, vector<1x32x8xf32>
    %22 = vector.shape_cast %21 : vector<1x32x8xf32> to vector<32x8xf32>
    %cst_21 = arith.constant dense<0.000000e+00> : vector<32x256xf32>
    %23 = tpu.matmul %22, %20, %cst_21 {dimension_numbers = #tpu.dot_dimension_numbers<[1], [1], [0], [0], [0, 0, 1, 0], [], []>} : vector<32x8xf32>, vector<256x8xf32>, vector<32x256xf32> -> vector<32x256xf32>
    %24 = arith.addf %18, %23 : vector<32x256xf32>
    %c0_22 = arith.constant 0 : index
    %c23 = arith.constant 23 : index
    %c0_23 = arith.constant 0 : index
    %25 = vector.load %arg1[%c0_22, %c23, %c0_23] : memref<1x304x8xf32, #tpu.memory_space<vmem>>, vector<1x256x8xf32>
    %26 = vector.shape_cast %25 : vector<1x256x8xf32> to vector<256x8xf32>
    %c3 = arith.constant 3 : index
    %c0_24 = arith.constant 0 : index
    %c0_25 = arith.constant 0 : index
    %27 = vector.load %arg8[%c3, %c0_24, %c0_25] : memref<9x32x8xf32, #tpu.memory_space<vmem>>, vector<1x32x8xf32>
    %28 = vector.shape_cast %27 : vector<1x32x8xf32> to vector<32x8xf32>
    %cst_26 = arith.constant dense<0.000000e+00> : vector<32x256xf32>
    %29 = tpu.matmul %28, %26, %cst_26 {dimension_numbers = #tpu.dot_dimension_numbers<[1], [1], [0], [0], [0, 0, 1, 0], [], []>} : vector<32x8xf32>, vector<256x8xf32>, vector<32x256xf32> -> vector<32x256xf32>
    %30 = arith.addf %24, %29 : vector<32x256xf32>
    %c0_27 = arith.constant 0 : index
    %c39 = arith.constant 39 : index
    %c0_28 = arith.constant 0 : index
    %31 = vector.load %arg1[%c0_27, %c39, %c0_28] : memref<1x304x8xf32, #tpu.memory_space<vmem>>, vector<1x256x8xf32>
    %32 = vector.shape_cast %31 : vector<1x256x8xf32> to vector<256x8xf32>
    %c6 = arith.constant 6 : index
    %c0_29 = arith.constant 0 : index
    %c0_30 = arith.constant 0 : index
    %33 = vector.load %arg8[%c6, %c0_29, %c0_30] : memref<9x32x8xf32, #tpu.memory_space<vmem>>, vector<1x32x8xf32>
    %34 = vector.shape_cast %33 : vector<1x32x8xf32> to vector<32x8xf32>
    %cst_31 = arith.constant dense<0.000000e+00> : vector<32x256xf32>
    %35 = tpu.matmul %34, %32, %cst_31 {dimension_numbers = #tpu.dot_dimension_numbers<[1], [1], [0], [0], [0, 0, 1, 0], [], []>} : vector<32x8xf32>, vector<256x8xf32>, vector<32x256xf32> -> vector<32x256xf32>
    %36 = arith.addf %30, %35 : vector<32x256xf32>
    %c0_32 = arith.constant 0 : index
    %c0_33 = arith.constant 0 : index
    %37 = vector.load %arg2[%c0_32, %c0_33] : memref<1x256xf32, #tpu.memory_space<vmem>>, vector<1x256xf32>
    %38 = vector.broadcast %37 : vector<1x256xf32> to vector<32x256xf32>
    %39 = arith.mulf %36, %38 : vector<32x256xf32>
    %40 = arith.addf %17, %39 : vector<32x256xf32>
    %cst_34 = arith.constant 0.000000e+00 : f32
    %41 = vector.broadcast %cst_34 : f32 to vector<32x256xf32>
    %c0_35 = arith.constant 0 : index
    %c8 = arith.constant 8 : index
    %c0_36 = arith.constant 0 : index
    %42 = vector.load %arg1[%c0_35, %c8, %c0_36] : memref<1x304x8xf32, #tpu.memory_space<vmem>>, vector<1x256x8xf32>
    %43 = vector.shape_cast %42 : vector<1x256x8xf32> to vector<256x8xf32>
    %c1 = arith.constant 1 : index
    %c0_37 = arith.constant 0 : index
    %c0_38 = arith.constant 0 : index
    %44 = vector.load %arg8[%c1, %c0_37, %c0_38] : memref<9x32x8xf32, #tpu.memory_space<vmem>>, vector<1x32x8xf32>
    %45 = vector.shape_cast %44 : vector<1x32x8xf32> to vector<32x8xf32>
    %cst_39 = arith.constant dense<0.000000e+00> : vector<32x256xf32>
    %46 = tpu.matmul %45, %43, %cst_39 {dimension_numbers = #tpu.dot_dimension_numbers<[1], [1], [0], [0], [0, 0, 1, 0], [], []>} : vector<32x8xf32>, vector<256x8xf32>, vector<32x256xf32> -> vector<32x256xf32>
    %47 = arith.addf %41, %46 : vector<32x256xf32>
    %c0_40 = arith.constant 0 : index
    %c24_41 = arith.constant 24 : index
    %c0_42 = arith.constant 0 : index
    %48 = vector.load %arg1[%c0_40, %c24_41, %c0_42] : memref<1x304x8xf32, #tpu.memory_space<vmem>>, vector<1x256x8xf32>
    %49 = vector.shape_cast %48 : vector<1x256x8xf32> to vector<256x8xf32>
    %c4 = arith.constant 4 : index
    %c0_43 = arith.constant 0 : index
    %c0_44 = arith.constant 0 : index
    %50 = vector.load %arg8[%c4, %c0_43, %c0_44] : memref<9x32x8xf32, #tpu.memory_space<vmem>>, vector<1x32x8xf32>
    %51 = vector.shape_cast %50 : vector<1x32x8xf32> to vector<32x8xf32>
    %cst_45 = arith.constant dense<0.000000e+00> : vector<32x256xf32>
    %52 = tpu.matmul %51, %49, %cst_45 {dimension_numbers = #tpu.dot_dimension_numbers<[1], [1], [0], [0], [0, 0, 1, 0], [], []>} : vector<32x8xf32>, vector<256x8xf32>, vector<32x256xf32> -> vector<32x256xf32>
    %53 = arith.addf %47, %52 : vector<32x256xf32>
    %c0_46 = arith.constant 0 : index
    %c40 = arith.constant 40 : index
    %c0_47 = arith.constant 0 : index
    %54 = vector.load %arg1[%c0_46, %c40, %c0_47] : memref<1x304x8xf32, #tpu.memory_space<vmem>>, vector<1x256x8xf32>
    %55 = vector.shape_cast %54 : vector<1x256x8xf32> to vector<256x8xf32>
    %c7_48 = arith.constant 7 : index
    %c0_49 = arith.constant 0 : index
    %c0_50 = arith.constant 0 : index
    %56 = vector.load %arg8[%c7_48, %c0_49, %c0_50] : memref<9x32x8xf32, #tpu.memory_space<vmem>>, vector<1x32x8xf32>
    %57 = vector.shape_cast %56 : vector<1x32x8xf32> to vector<32x8xf32>
    %cst_51 = arith.constant dense<0.000000e+00> : vector<32x256xf32>
    %58 = tpu.matmul %57, %55, %cst_51 {dimension_numbers = #tpu.dot_dimension_numbers<[1], [1], [0], [0], [0, 0, 1, 0], [], []>} : vector<32x8xf32>, vector<256x8xf32>, vector<32x256xf32> -> vector<32x256xf32>
    %59 = arith.addf %53, %58 : vector<32x256xf32>
    %60 = arith.addf %40, %59 : vector<32x256xf32>
    %cst_52 = arith.constant 0.000000e+00 : f32
    %61 = vector.broadcast %cst_52 : f32 to vector<32x256xf32>
    %c0_53 = arith.constant 0 : index
    %c9 = arith.constant 9 : index
    %c0_54 = arith.constant 0 : index
    %62 = vector.load %arg1[%c0_53, %c9, %c0_54] : memref<1x304x8xf32, #tpu.memory_space<vmem>>, vector<1x256x8xf32>
    %63 = vector.shape_cast %62 : vector<1x256x8xf32> to vector<256x8xf32>
    %c2 = arith.constant 2 : index
    %c0_55 = arith.constant 0 : index
    %c0_56 = arith.constant 0 : index
    %64 = vector.load %arg8[%c2, %c0_55, %c0_56] : memref<9x32x8xf32, #tpu.memory_space<vmem>>, vector<1x32x8xf32>
    %65 = vector.shape_cast %64 : vector<1x32x8xf32> to vector<32x8xf32>
    %cst_57 = arith.constant dense<0.000000e+00> : vector<32x256xf32>
    %66 = tpu.matmul %65, %63, %cst_57 {dimension_numbers = #tpu.dot_dimension_numbers<[1], [1], [0], [0], [0, 0, 1, 0], [], []>} : vector<32x8xf32>, vector<256x8xf32>, vector<32x256xf32> -> vector<32x256xf32>
    %67 = arith.addf %61, %66 : vector<32x256xf32>
    %c0_58 = arith.constant 0 : index
    %c25 = arith.constant 25 : index
    %c0_59 = arith.constant 0 : index
    %68 = vector.load %arg1[%c0_58, %c25, %c0_59] : memref<1x304x8xf32, #tpu.memory_space<vmem>>, vector<1x256x8xf32>
    %69 = vector.shape_cast %68 : vector<1x256x8xf32> to vector<256x8xf32>
    %c5 = arith.constant 5 : index
    %c0_60 = arith.constant 0 : index
    %c0_61 = arith.constant 0 : index
    %70 = vector.load %arg8[%c5, %c0_60, %c0_61] : memref<9x32x8xf32, #tpu.memory_space<vmem>>, vector<1x32x8xf32>
    %71 = vector.shape_cast %70 : vector<1x32x8xf32> to vector<32x8xf32>
    %cst_62 = arith.constant dense<0.000000e+00> : vector<32x256xf32>
    %72 = tpu.matmul %71, %69, %cst_62 {dimension_numbers = #tpu.dot_dimension_numbers<[1], [1], [0], [0], [0, 0, 1, 0], [], []>} : vector<32x8xf32>, vector<256x8xf32>, vector<32x256xf32> -> vector<32x256xf32>
    %73 = arith.addf %67, %72 : vector<32x256xf32>
    %c0_63 = arith.constant 0 : index
    %c41 = arith.constant 41 : index
    %c0_64 = arith.constant 0 : index
    %74 = vector.load %arg1[%c0_63, %c41, %c0_64] : memref<1x304x8xf32, #tpu.memory_space<vmem>>, vector<1x256x8xf32>
    %75 = vector.shape_cast %74 : vector<1x256x8xf32> to vector<256x8xf32>
    %c8_65 = arith.constant 8 : index
    %c0_66 = arith.constant 0 : index
    %c0_67 = arith.constant 0 : index
    %76 = vector.load %arg8[%c8_65, %c0_66, %c0_67] : memref<9x32x8xf32, #tpu.memory_space<vmem>>, vector<1x32x8xf32>
    %77 = vector.shape_cast %76 : vector<1x32x8xf32> to vector<32x8xf32>
    %cst_68 = arith.constant dense<0.000000e+00> : vector<32x256xf32>
    %78 = tpu.matmul %77, %75, %cst_68 {dimension_numbers = #tpu.dot_dimension_numbers<[1], [1], [0], [0], [0, 0, 1, 0], [], []>} : vector<32x8xf32>, vector<256x8xf32>, vector<32x256xf32> -> vector<32x256xf32>
    %79 = arith.addf %73, %78 : vector<32x256xf32>
    %c0_69 = arith.constant 0 : index
    %c0_70 = arith.constant 0 : index
    %80 = vector.load %arg3[%c0_69, %c0_70] : memref<1x256xf32, #tpu.memory_space<vmem>>, vector<1x256xf32>
    %81 = vector.broadcast %80 : vector<1x256xf32> to vector<32x256xf32>
    %82 = arith.mulf %79, %81 : vector<32x256xf32>
    %83 = arith.addf %60, %82 : vector<32x256xf32>
    %c0_71 = arith.constant 0 : index
    %c0_72 = arith.constant 0 : index
    %84 = vector.load %arg9[%c0_71, %c0_72] : memref<32x1xf32, #tpu.memory_space<vmem>>, vector<32x1xf32>
    %85 = vector.broadcast %84 : vector<32x1xf32> to vector<32x256xf32>
    %86 = arith.addf %83, %85 : vector<32x256xf32>
    %cst_73 = arith.constant 0.000000e+00 : f32
    %87 = vector.broadcast %cst_73 : f32 to vector<32x256xf32>
    %88 = arith.maximumf %86, %87 : vector<32x256xf32>
    %cst_74 = arith.constant dense<0xFF800000> : vector<8xf32>
    %89 = vector.multi_reduction <maximumf>, %13, %cst_74 [1] : vector<8x256xf32> to vector<8xf32>
    %90 = vector.shape_cast %89 : vector<8xf32> to vector<8x1xf32>
    %91 = vector.broadcast %90 : vector<8x1xf32> to vector<8x256xf32>
    %92 = arith.subf %13, %91 : vector<8x256xf32>
    %93 = math.exp %92 : vector<8x256xf32>
    %cst_75 = arith.constant dense<0.000000e+00> : vector<8xf32>
    %94 = vector.multi_reduction <add>, %93, %cst_75 [1] : vector<8x256xf32> to vector<8xf32>
    %95 = vector.shape_cast %94 : vector<8xf32> to vector<8x1xf32>
    %96 = tpu.reciprocal %95 {approx = true} : vector<8x1xf32> -> vector<8x1xf32>
    %97 = vector.broadcast %96 : vector<8x1xf32> to vector<8x256xf32>
    %98 = arith.mulf %93, %97 : vector<8x256xf32>
    %cst_76 = arith.constant dense<0.000000e+00> : vector<8x32xf32>
    %99 = tpu.matmul %98, %88, %cst_76 {dimension_numbers = #tpu.dot_dimension_numbers<[1], [1], [0], [0], [0, 0, 1, 0], [], []>} : vector<8x256xf32>, vector<32x256xf32>, vector<8x32xf32> -> vector<8x32xf32>
    %cst_77 = arith.constant dense<0.000000e+00> : vector<32x8xf32>
    %100 = tpu.matmul %88, %98, %cst_77 {dimension_numbers = #tpu.dot_dimension_numbers<[1], [1], [0], [0], [0, 0, 1, 0], [], []>} : vector<32x256xf32>, vector<8x256xf32>, vector<32x8xf32> -> vector<32x8xf32>
    %c0_78 = arith.constant 0 : index
    %c0_79 = arith.constant 0 : index
    %101 = vector.load %arg10[%c0_78, %c0_79] : memref<16x32xf32, #tpu.memory_space<vmem>>, vector<16x32xf32>
    %cst_80 = arith.constant dense<0.000000e+00> : vector<16x256xf32>
    %102 = tpu.matmul %101, %88, %cst_80 {dimension_numbers = #tpu.dot_dimension_numbers<[1], [0], [0], [1], [0, 0, 1, 1], [], []>} : vector<16x32xf32>, vector<32x256xf32>, vector<16x256xf32> -> vector<16x256xf32>
    %c0_81 = arith.constant 0 : index
    %c0_82 = arith.constant 0 : index
    %103 = vector.load %arg11[%c0_81, %c0_82] : memref<16x1xf32, #tpu.memory_space<vmem>>, vector<16x1xf32>
    %104 = vector.broadcast %103 : vector<16x1xf32> to vector<16x256xf32>
    %105 = arith.addf %102, %104 : vector<16x256xf32>
    %cst_83 = arith.constant 0.000000e+00 : f32
    %106 = vector.broadcast %cst_83 : f32 to vector<16x256xf32>
    %107 = arith.maximumf %105, %106 : vector<16x256xf32>
    %c0_84 = arith.constant 0 : index
    %c0_85 = arith.constant 0 : index
    %108 = vector.load %arg12[%c0_84, %c0_85] : memref<16x16xf32, #tpu.memory_space<vmem>>, vector<16x16xf32>
    %cst_86 = arith.constant dense<0.000000e+00> : vector<16x256xf32>
    %109 = tpu.matmul %108, %107, %cst_86 {dimension_numbers = #tpu.dot_dimension_numbers<[1], [0], [0], [1], [0, 0, 1, 1], [], []>} : vector<16x16xf32>, vector<16x256xf32>, vector<16x256xf32> -> vector<16x256xf32>
    %c0_87 = arith.constant 0 : index
    %c0_88 = arith.constant 0 : index
    %110 = vector.load %arg13[%c0_87, %c0_88] : memref<16x1xf32, #tpu.memory_space<vmem>>, vector<16x1xf32>
    %111 = vector.broadcast %110 : vector<16x1xf32> to vector<16x256xf32>
    %112 = arith.addf %109, %111 : vector<16x256xf32>
    %cst_89 = arith.constant 0.000000e+00 : f32
    %113 = vector.broadcast %cst_89 : f32 to vector<16x256xf32>
    %114 = arith.maximumf %112, %113 : vector<16x256xf32>
    %c0_90 = arith.constant 0 : index
    %c0_91 = arith.constant 0 : index
    %115 = vector.load %arg14[%c0_90, %c0_91] : memref<32x16xf32, #tpu.memory_space<vmem>>, vector<32x16xf32>
    %cst_92 = arith.constant dense<0.000000e+00> : vector<8x16xf32>
    %116 = tpu.matmul %99, %115, %cst_92 {dimension_numbers = #tpu.dot_dimension_numbers<[1], [0], [0], [1], [0, 0, 1, 1], [], []>} : vector<8x32xf32>, vector<32x16xf32>, vector<8x16xf32> -> vector<8x16xf32>
    %c0_93 = arith.constant 0 : index
    %c0_94 = arith.constant 0 : index
    %117 = vector.load %arg15[%c0_93, %c0_94] : memref<1x16xf32, #tpu.memory_space<vmem>>, vector<1x16xf32>
    %118 = vector.broadcast %117 : vector<1x16xf32> to vector<8x16xf32>
    %119 = arith.addf %116, %118 : vector<8x16xf32>
    %cst_95 = arith.constant 0.000000e+00 : f32
    %120 = vector.broadcast %cst_95 : f32 to vector<8x16xf32>
    %121 = arith.maximumf %119, %120 : vector<8x16xf32>
    %c0_96 = arith.constant 0 : index
    %c0_97 = arith.constant 0 : index
    %122 = vector.load %arg16[%c0_96, %c0_97] : memref<16x16xf32, #tpu.memory_space<vmem>>, vector<16x16xf32>
    %cst_98 = arith.constant dense<0.000000e+00> : vector<8x16xf32>
    %123 = tpu.matmul %121, %122, %cst_98 {dimension_numbers = #tpu.dot_dimension_numbers<[1], [0], [0], [1], [0, 0, 1, 1], [], []>} : vector<8x16xf32>, vector<16x16xf32>, vector<8x16xf32> -> vector<8x16xf32>
    %c0_99 = arith.constant 0 : index
    %c0_100 = arith.constant 0 : index
    %124 = vector.load %arg17[%c0_99, %c0_100] : memref<1x16xf32, #tpu.memory_space<vmem>>, vector<1x16xf32>
    %125 = vector.broadcast %124 : vector<1x16xf32> to vector<8x16xf32>
    %126 = arith.addf %123, %125 : vector<8x16xf32>
    %cst_101 = arith.constant 0.000000e+00 : f32
    %127 = vector.broadcast %cst_101 : f32 to vector<8x16xf32>
    %128 = arith.maximumf %126, %127 : vector<8x16xf32>
    %c0_102 = arith.constant 0 : index
    %c0_103 = arith.constant 0 : index
    %129 = vector.load %arg18[%c0_102, %c0_103] : memref<16x32xf32, #tpu.memory_space<vmem>>, vector<16x32xf32>
    %cst_104 = arith.constant dense<0.000000e+00> : vector<16x8xf32>
    %130 = tpu.matmul %129, %100, %cst_104 {dimension_numbers = #tpu.dot_dimension_numbers<[1], [0], [0], [1], [0, 0, 1, 1], [], []>} : vector<16x32xf32>, vector<32x8xf32>, vector<16x8xf32> -> vector<16x8xf32>
    %c0_105 = arith.constant 0 : index
    %c0_106 = arith.constant 0 : index
    %131 = vector.load %arg19[%c0_105, %c0_106] : memref<16x1xf32, #tpu.memory_space<vmem>>, vector<16x1xf32>
    %132 = vector.broadcast %131 : vector<16x1xf32> to vector<16x8xf32>
    %133 = arith.addf %130, %132 : vector<16x8xf32>
    %cst_107 = arith.constant 0.000000e+00 : f32
    %134 = vector.broadcast %cst_107 : f32 to vector<16x8xf32>
    %135 = arith.maximumf %133, %134 : vector<16x8xf32>
    %cst_108 = arith.constant dense<0.000000e+00> : vector<8x256xf32>
    %136 = tpu.matmul %128, %114, %cst_108 {dimension_numbers = #tpu.dot_dimension_numbers<[1], [0], [0], [1], [0, 0, 1, 1], [], []>} : vector<8x16xf32>, vector<16x256xf32>, vector<8x256xf32> -> vector<8x256xf32>
    %cst_109 = arith.constant 2.500000e-01 : f32
    %137 = vector.broadcast %cst_109 : f32 to vector<8x256xf32>
    %138 = arith.mulf %136, %137 : vector<8x256xf32>
    %cst_110 = arith.constant dense<0xFF800000> : vector<256xf32>
    %139 = vector.multi_reduction <maximumf>, %138, %cst_110 [0] : vector<8x256xf32> to vector<256xf32>
    %140 = vector.shape_cast %139 : vector<256xf32> to vector<1x256xf32>
    %141 = vector.broadcast %140 : vector<1x256xf32> to vector<8x256xf32>
    %142 = arith.subf %138, %141 : vector<8x256xf32>
    %143 = math.exp %142 : vector<8x256xf32>
    %cst_111 = arith.constant dense<0.000000e+00> : vector<256xf32>
    %144 = vector.multi_reduction <add>, %143, %cst_111 [0] : vector<8x256xf32> to vector<256xf32>
    %145 = vector.shape_cast %144 : vector<256xf32> to vector<1x256xf32>
    %146 = tpu.reciprocal %145 {approx = true} : vector<1x256xf32> -> vector<1x256xf32>
    %147 = vector.broadcast %146 : vector<1x256xf32> to vector<8x256xf32>
    %148 = arith.mulf %143, %147 : vector<8x256xf32>
    %cst_112 = arith.constant dense<0.000000e+00> : vector<16x256xf32>
    %149 = tpu.matmul %135, %148, %cst_112 {dimension_numbers = #tpu.dot_dimension_numbers<[1], [0], [0], [1], [0, 0, 1, 1], [], []>} : vector<16x8xf32>, vector<8x256xf32>, vector<16x256xf32> -> vector<16x256xf32>
    %c0_113 = arith.constant 0 : index
    %c0_114 = arith.constant 0 : index
    %150 = vector.load %arg20[%c0_113, %c0_114] : memref<32x16xf32, #tpu.memory_space<vmem>>, vector<32x16xf32>
    %cst_115 = arith.constant dense<0.000000e+00> : vector<32x256xf32>
    %151 = tpu.matmul %150, %149, %cst_115 {dimension_numbers = #tpu.dot_dimension_numbers<[1], [0], [0], [1], [0, 0, 1, 1], [], []>} : vector<32x16xf32>, vector<16x256xf32>, vector<32x256xf32> -> vector<32x256xf32>
    %c0_116 = arith.constant 0 : index
    %c0_117 = arith.constant 0 : index
    %152 = vector.load %arg21[%c0_116, %c0_117] : memref<32x1xf32, #tpu.memory_space<vmem>>, vector<32x1xf32>
    %153 = vector.broadcast %152 : vector<32x1xf32> to vector<32x256xf32>
    %154 = arith.addf %151, %153 : vector<32x256xf32>
    %cst_118 = arith.constant 0.000000e+00 : f32
    %155 = vector.broadcast %cst_118 : f32 to vector<32x256xf32>
    %156 = arith.maximumf %154, %155 : vector<32x256xf32>
    %c0_119 = arith.constant 0 : index
    %c0_120 = arith.constant 0 : index
    %157 = vector.load %arg22[%c0_119, %c0_120] : memref<32x32xf32, #tpu.memory_space<vmem>>, vector<32x32xf32>
    %cst_121 = arith.constant dense<0.000000e+00> : vector<32x256xf32>
    %158 = tpu.matmul %157, %156, %cst_121 {dimension_numbers = #tpu.dot_dimension_numbers<[1], [0], [0], [1], [0, 0, 1, 1], [], []>} : vector<32x32xf32>, vector<32x256xf32>, vector<32x256xf32> -> vector<32x256xf32>
    %c0_122 = arith.constant 0 : index
    %c0_123 = arith.constant 0 : index
    %159 = vector.load %arg23[%c0_122, %c0_123] : memref<32x32xf32, #tpu.memory_space<vmem>>, vector<32x32xf32>
    %cst_124 = arith.constant dense<0.000000e+00> : vector<32x256xf32>
    %160 = tpu.matmul %159, %88, %cst_124 {dimension_numbers = #tpu.dot_dimension_numbers<[1], [0], [0], [1], [0, 0, 1, 1], [], []>} : vector<32x32xf32>, vector<32x256xf32>, vector<32x256xf32> -> vector<32x256xf32>
    %161 = arith.addf %158, %160 : vector<32x256xf32>
    %c0_125 = arith.constant 0 : index
    %c0_126 = arith.constant 0 : index
    %162 = vector.load %arg24[%c0_125, %c0_126] : memref<32x1xf32, #tpu.memory_space<vmem>>, vector<32x1xf32>
    %163 = vector.broadcast %162 : vector<32x1xf32> to vector<32x256xf32>
    %164 = arith.addf %161, %163 : vector<32x256xf32>
    %cst_127 = arith.constant 0.000000e+00 : f32
    %165 = vector.broadcast %cst_127 : f32 to vector<32x256xf32>
    %166 = arith.maximumf %164, %165 : vector<32x256xf32>
    %c0_128 = arith.constant 0 : index
    %c0_129 = arith.constant 0 : index
    %167 = vector.load %arg25[%c0_128, %c0_129] : memref<8x32xf32, #tpu.memory_space<vmem>>, vector<8x32xf32>
    %cst_130 = arith.constant dense<0.000000e+00> : vector<8x256xf32>
    %168 = tpu.matmul %167, %166, %cst_130 {dimension_numbers = #tpu.dot_dimension_numbers<[1], [0], [0], [1], [0, 0, 1, 1], [], []>} : vector<8x32xf32>, vector<32x256xf32>, vector<8x256xf32> -> vector<8x256xf32>
    %c0_131 = arith.constant 0 : index
    %c0_132 = arith.constant 0 : index
    %169 = vector.load %arg26[%c0_131, %c0_132] : memref<8x1xf32, #tpu.memory_space<vmem>>, vector<8x1xf32>
    %170 = vector.broadcast %169 : vector<8x1xf32> to vector<8x256xf32>
    %171 = arith.addf %168, %170 : vector<8x256xf32>
    %c0_133 = arith.constant 0 : index
    %c0_134 = arith.constant 0 : index
    %c0_135 = arith.constant 0 : index
    %172 = vector.load %arg29[%c0_133, %c0_134, %c0_135] : memref<1x32x256xf32, #tpu.memory_space<vmem>>, vector<1x32x256xf32>
    %173 = vector.shape_cast %172 : vector<1x32x256xf32> to vector<32x256xf32>
    %174 = vector.shape_cast %166 : vector<32x256xf32> to vector<1x32x256xf32>
    tpu.vector_store %arg29[%c0_133, %c0_134, %c0_135], %174 {strides = array<i32>} : memref<1x32x256xf32, #tpu.memory_space<vmem>>, vector<1x32x256xf32>,
    %c0_136 = arith.constant 0 : index
    %c0_137 = arith.constant 0 : index
    %c0_138 = arith.constant 0 : index
    %175 = vector.load %arg28[%c0_136, %c0_137, %c0_138] : memref<1x8x256xf32, #tpu.memory_space<vmem>>, vector<1x8x256xf32>
    %176 = vector.shape_cast %175 : vector<1x8x256xf32> to vector<8x256xf32>
    %177 = vector.shape_cast %171 : vector<8x256xf32> to vector<1x8x256xf32>
    tpu.vector_store %arg28[%c0_136, %c0_137, %c0_138], %177 {strides = array<i32>} : memref<1x8x256xf32, #tpu.memory_space<vmem>>, vector<1x8x256xf32>,
    return
  }
  func.func @transform_0(%arg0: i32) -> (i32, i32, i32) {
    %c0_i32 = arith.constant 0 : i32
    %c0_i32_0 = arith.constant 0 : i32
    %c0_i32_1 = arith.constant 0 : i32
    return %arg0, %c0_i32, %c0_i32_0 : i32, i32, i32
  }
  func.func @transform_1(%arg0: i32) -> (i32, i32) {
    %c0_i32 = arith.constant 0 : i32
    %c0_i32_0 = arith.constant 0 : i32
    %c0_i32_1 = arith.constant 0 : i32
    return %c0_i32, %c0_i32_0 : i32, i32
  }
  func.func @transform_2(%arg0: i32) -> (i32, i32) {
    %c0_i32 = arith.constant 0 : i32
    %c0_i32_0 = arith.constant 0 : i32
    %c0_i32_1 = arith.constant 0 : i32
    return %c0_i32, %c0_i32_0 : i32, i32
  }
  func.func @transform_3(%arg0: i32) -> (i32, i32) {
    %c0_i32 = arith.constant 0 : i32
    %c0_i32_0 = arith.constant 0 : i32
    %c0_i32_1 = arith.constant 0 : i32
    return %c0_i32, %c0_i32_0 : i32, i32
  }
  func.func @transform_4(%arg0: i32) -> (i32, i32) {
    %c0_i32 = arith.constant 0 : i32
    %c0_i32_0 = arith.constant 0 : i32
    %c0_i32_1 = arith.constant 0 : i32
    return %c0_i32, %c0_i32_0 : i32, i32
  }
  func.func @transform_5(%arg0: i32) -> (i32, i32) {
    %c0_i32 = arith.constant 0 : i32
    %c0_i32_0 = arith.constant 0 : i32
    %c0_i32_1 = arith.constant 0 : i32
    return %c0_i32, %c0_i32_0 : i32, i32
  }
  func.func @transform_6(%arg0: i32) -> (i32, i32) {
    %c0_i32 = arith.constant 0 : i32
    %c0_i32_0 = arith.constant 0 : i32
    %c0_i32_1 = arith.constant 0 : i32
    return %c0_i32, %c0_i32_0 : i32, i32
  }
  func.func @transform_7(%arg0: i32) -> (i32, i32, i32) {
    %c0_i32 = arith.constant 0 : i32
    %c0_i32_0 = arith.constant 0 : i32
    %c0_i32_1 = arith.constant 0 : i32
    %c0_i32_2 = arith.constant 0 : i32
    return %c0_i32, %c0_i32_0, %c0_i32_1 : i32, i32, i32
  }
  func.func @transform_8(%arg0: i32) -> (i32, i32) {
    %c0_i32 = arith.constant 0 : i32
    %c0_i32_0 = arith.constant 0 : i32
    %c0_i32_1 = arith.constant 0 : i32
    return %c0_i32, %c0_i32_0 : i32, i32
  }
  func.func @transform_9(%arg0: i32) -> (i32, i32) {
    %c0_i32 = arith.constant 0 : i32
    %c0_i32_0 = arith.constant 0 : i32
    %c0_i32_1 = arith.constant 0 : i32
    return %c0_i32, %c0_i32_0 : i32, i32
  }
  func.func @transform_10(%arg0: i32) -> (i32, i32) {
    %c0_i32 = arith.constant 0 : i32
    %c0_i32_0 = arith.constant 0 : i32
    %c0_i32_1 = arith.constant 0 : i32
    return %c0_i32, %c0_i32_0 : i32, i32
  }
  func.func @transform_11(%arg0: i32) -> (i32, i32) {
    %c0_i32 = arith.constant 0 : i32
    %c0_i32_0 = arith.constant 0 : i32
    %c0_i32_1 = arith.constant 0 : i32
    return %c0_i32, %c0_i32_0 : i32, i32
  }
  func.func @transform_12(%arg0: i32) -> (i32, i32) {
    %c0_i32 = arith.constant 0 : i32
    %c0_i32_0 = arith.constant 0 : i32
    %c0_i32_1 = arith.constant 0 : i32
    return %c0_i32, %c0_i32_0 : i32, i32
  }
  func.func @transform_13(%arg0: i32) -> (i32, i32) {
    %c0_i32 = arith.constant 0 : i32
    %c0_i32_0 = arith.constant 0 : i32
    %c0_i32_1 = arith.constant 0 : i32
    return %c0_i32, %c0_i32_0 : i32, i32
  }
  func.func @transform_14(%arg0: i32) -> (i32, i32) {
    %c0_i32 = arith.constant 0 : i32
    %c0_i32_0 = arith.constant 0 : i32
    %c0_i32_1 = arith.constant 0 : i32
    return %c0_i32, %c0_i32_0 : i32, i32
  }
  func.func @transform_15(%arg0: i32) -> (i32, i32) {
    %c0_i32 = arith.constant 0 : i32
    %c0_i32_0 = arith.constant 0 : i32
    %c0_i32_1 = arith.constant 0 : i32
    return %c0_i32, %c0_i32_0 : i32, i32
  }
  func.func @transform_16(%arg0: i32) -> (i32, i32) {
    %c0_i32 = arith.constant 0 : i32
    %c0_i32_0 = arith.constant 0 : i32
    %c0_i32_1 = arith.constant 0 : i32
    return %c0_i32, %c0_i32_0 : i32, i32
  }
  func.func @transform_17(%arg0: i32) -> (i32, i32) {
    %c0_i32 = arith.constant 0 : i32
    %c0_i32_0 = arith.constant 0 : i32
    %c0_i32_1 = arith.constant 0 : i32
    return %c0_i32, %c0_i32_0 : i32, i32
  }
  func.func @transform_18(%arg0: i32) -> (i32, i32) {
    %c0_i32 = arith.constant 0 : i32
    %c0_i32_0 = arith.constant 0 : i32
    %c0_i32_1 = arith.constant 0 : i32
    return %c0_i32, %c0_i32_0 : i32, i32
  }
  func.func @transform_19(%arg0: i32) -> (i32, i32) {
    %c0_i32 = arith.constant 0 : i32
    %c0_i32_0 = arith.constant 0 : i32
    %c0_i32_1 = arith.constant 0 : i32
    return %c0_i32, %c0_i32_0 : i32, i32
  }
  func.func @transform_20(%arg0: i32) -> (i32, i32) {
    %c0_i32 = arith.constant 0 : i32
    %c0_i32_0 = arith.constant 0 : i32
    %c0_i32_1 = arith.constant 0 : i32
    return %c0_i32, %c0_i32_0 : i32, i32
  }
  func.func @transform_21(%arg0: i32) -> (i32, i32) {
    %c0_i32 = arith.constant 0 : i32
    %c0_i32_0 = arith.constant 0 : i32
    %c0_i32_1 = arith.constant 0 : i32
    return %c0_i32, %c0_i32_0 : i32, i32
  }
  func.func @transform_22(%arg0: i32) -> (i32, i32) {
    %c0_i32 = arith.constant 0 : i32
    %c0_i32_0 = arith.constant 0 : i32
    %c0_i32_1 = arith.constant 0 : i32
    return %c0_i32, %c0_i32_0 : i32, i32
  }
  func.func @transform_23(%arg0: i32) -> (i32, i32) {
    %c0_i32 = arith.constant 0 : i32
    %c0_i32_0 = arith.constant 0 : i32
    %c0_i32_1 = arith.constant 0 : i32
    return %c0_i32, %c0_i32_0 : i32, i32
  }
  func.func @transform_24(%arg0: i32) -> (i32, i32) {
    %c0_i32 = arith.constant 0 : i32
    %c0_i32_0 = arith.constant 0 : i32
    %c0_i32_1 = arith.constant 0 : i32
    return %c0_i32, %c0_i32_0 : i32, i32
  }
  func.func @transform_25(%arg0: i32) -> (i32, i32) {
    %c0_i32 = arith.constant 0 : i32
    %c0_i32_0 = arith.constant 0 : i32
    %c0_i32_1 = arith.constant 0 : i32
    return %c0_i32, %c0_i32_0 : i32, i32
  }
  func.func @transform_26(%arg0: i32) -> (i32, i32, i32) {
    %c0_i32 = arith.constant 0 : i32
    %c0_i32_0 = arith.constant 0 : i32
    %c0_i32_1 = arith.constant 0 : i32
    return %arg0, %c0_i32, %c0_i32_0 : i32, i32, i32
  }
  func.func @transform_27(%arg0: i32) -> (i32, i32, i32) {
    %c0_i32 = arith.constant 0 : i32
    %c0_i32_0 = arith.constant 0 : i32
    %c0_i32_1 = arith.constant 0 : i32
    return %arg0, %c0_i32, %c0_i32_0 : i32, i32, i32
  }
  func.func @transform_28(%arg0: i32) -> (i32, i32, i32) {
    %c0_i32 = arith.constant 0 : i32
    %c0_i32_0 = arith.constant 0 : i32
    %c0_i32_1 = arith.constant 0 : i32
    return %arg0, %c0_i32, %c0_i32_0 : i32, i32, i32
  }
}

</mosaic_0001>

<bundles_post_ra>
// kernel: ocrnet_forward.1
= control target key start
LH: loop header
LB: loop body
LE: loop exit
PB: predicated region body
PF: predicated region fallthrough
CT: control target
= control target key end

     0   :  { %s7330_s0 = inlined_call_operand.vmem [shape: f32[2,304,8], index: 0, kind: input, shape index: {}]   ;;  %s7331_s1 = inlined_call_operand.vmem [shape: f32[1,256], index: 1, kind: input, shape index: {}]   ;;  %s7332_s2 = inlined_call_operand.vmem [shape: f32[1,256], index: 2, kind: input, shape index: {}]   ;;  %s7333_s3 = inlined_call_operand.vmem [shape: f32[8,8], index: 3, kind: input, shape index: {}]   ;;  %s7334_s4 = inlined_call_operand.vmem [shape: f32[8,1], index: 4, kind: input, shape index: {}]   ;;  %s7335_s5 = inlined_call_operand.vmem [shape: f32[8,8], index: 5, kind: input, shape index: {}]   ;;  %s7336_s6 = inlined_call_operand.vmem [shape: f32[8,1], index: 6, kind: input, shape index: {}]   ;;  %s7337_s7 = inlined_call_operand.vmem [shape: f32[9,32,8], index: 7, kind: input, shape index: {}]   ;;  %s7338_s8 = inlined_call_operand.vmem [shape: f32[32,1], index: 8, kind: input, shape index: {}]   ;;  %s7339_s9 = inlined_call_operand.vmem [shape: f32[16,32], index: 9, kind: input, shape index: {}]   ;;  %s7340_s10 = inlined_call_operand.vmem [shape: f32[16,1], index: 10, kind: input, shape index: {}]   ;;  %s7341_s11 = inlined_call_operand.vmem [shape: f32[16,16], index: 11, kind: input, shape index: {}]   ;;  %s7342_s12 = inlined_call_operand.vmem [shape: f32[16,1], index: 12, kind: input, shape index: {}]   ;;  %s7343_s13 = inlined_call_operand.vmem [shape: f32[32,16], index: 13, kind: input, shape index: {}]   ;;  %s7344_s14 = inlined_call_operand.vmem [shape: f32[1,16], index: 14, kind: input, shape index: {}]   ;;  %s7345_s15 = inlined_call_operand.vmem [shape: f32[16,16], index: 15, kind: input, shape index: {}]   ;;  %s7346_s16 = inlined_call_operand.vmem [shape: f32[1,16], index: 16, kind: input, shape index: {}]   ;;  %s7347_s17 = inlined_call_operand.vmem [shape: f32[16,32], index: 17, kind: input, shape index: {}]   ;;  %s7348_s18 = inlined_call_operand.vmem [shape: f32[16,1], index: 18, kind: input, shape index: {}]   ;;  %s7349_s19 = inlined_call_operand.vmem [shape: f32[32,16], index: 19, kind: input, shape index: {}]   ;;  %s7350_s20 = inlined_call_operand.vmem [shape: f32[32,1], index: 20, kind: input, shape index: {}]   ;;  %s7351_s21 = inlined_call_operand.vmem [shape: f32[32,32], index: 21, kind: input, shape index: {}]   ;;  %s7352_s22 = inlined_call_operand.vmem [shape: f32[32,32], index: 22, kind: input, shape index: {}]   ;;  %s7353_s23 = inlined_call_operand.vmem [shape: f32[32,1], index: 23, kind: input, shape index: {}]   ;;  %s7354_s24 = inlined_call_operand.vmem [shape: f32[8,32], index: 24, kind: input, shape index: {}]   ;;  %s7355_s25 = inlined_call_operand.vmem [shape: f32[8,1], index: 25, kind: input, shape index: {}]   ;;  %s7356_s26 = inlined_call_operand.vmem [shape: f32[2,8,256], index: 26, kind: output, shape index: {0}]   ;;  %s7357_s27 = inlined_call_operand.vmem [shape: f32[2,8,256], index: 27, kind: output, shape index: {1}]   ;;  %s7358_s28 = inlined_call_operand.vmem [shape: f32[2,32,256], index: 28, kind: output, shape index: {2}]  }
   0x1   :  { %7367 = sst [smem:[#allocation2_spill]] %s7330_s0 }
   0x2   :  { %7368 = sst [smem:[#allocation3_spill]] %s7331_s1 }
   0x3   :  { %7369 = sst [smem:[#allocation4_spill]] %s7332_s2 }
   0x4   :  { %7370 = sst [smem:[#allocation5_spill]] %s7333_s3 }
   0x5   :  { %7371 = sst [smem:[#allocation6_spill]] %s7334_s4 }
   0x6   :  { %7372 = sst [smem:[#allocation7_spill]] %s7335_s5 }
   0x7   :  { %7373 = sst [smem:[#allocation8_spill]] %s7336_s6 }
   0x8   :  { %7374 = sst [smem:[#allocation9_spill]] %s7337_s7 }
   0x9   :  { %7375 = sst [smem:[#allocation10_spill]] %s7338_s8  ;;  %s6131_s8 = smov 0  }
   0xa   :  { %7376 = sst [smem:[#allocation11_spill]] %s7339_s9 }
   0xb   :  { %7377 = sst [smem:[#allocation12_spill]] %s7340_s10 }
   0xc   :  { %7378 = sst [smem:[#allocation13_spill]] %s7341_s11 }
   0xd   :  { %7379 = sst [smem:[#allocation14_spill]] %s7342_s12 }
   0xe LB: > { %s4470_s5 = sadd.s32 4294967295, %s5980_s8   ;;  %p4474_p0 = scmp.ge.s32.totalorder %s5980_s8, 1  ;;  %s5980_s8 = sphi %s6131_s8, %s39_s8  }
   0xf   : > { %p767_p1 = scmp.lt.s32.totalorder %s5980_s8, 3 }
  0x11   : > { %p768_p2 = pnand %p4474_p0, %p767_p1 }
  0x12   : > { %p851_p3 = scmp.lt.s32.totalorder (!%p768_p2), %s4470_s5, 1  ;;  %vm910_vm0 = vcmask (!%p768_p2), 64512   ;;  %s7380_s3 = sld [smem:[#allocation5_spill]] (!%p768_p2)  ;;  %v5982_v3 = vmov (!%p768_p2), 0   ;;  %vm3223_vm2 = vcmask (!%p768_p2), 261120   ;;  %vm3325_vm3 = vcmask (!%p768_p2), 130048  }
  0x13   : > { %771 = sbr.rel (%p768_p2) target bundleno = 2715 (0xa9b), region = 124  ;;  %s7381_s0 = sld [smem:[#allocation9_spill]] (!%p768_p2)  ;;  %5958 = vset.pattern.permute.xlu0 (!%p768_p2), %v5982_v3  ;;  %5959 = vset.pattern.permute.xlu1 (!%p768_p2), %v5982_v3  ;;  %vm6169_vm1 = vmpackc.low (!%p768_p2), %vm910_vm0, %vm910_vm0  ;;  %vm5985_vm4 = vmmov (!%p768_p2), 0  }
  0x14   : > { %s7382_s2 = sld [smem:[#allocation6_spill]] (!%p768_p2)  ;;  %s7383_s4 = sld [smem:[#allocation8_spill]] (!%p768_p2) }
  0x15   : > { %s7387_s29 = sld [smem:[#allocation10_spill]] (!%p768_p2)  ;;  %s7390_s10 = sld [smem:[#allocation14_spill]] (!%p768_p2) }
  0x16   : > { %s7392_s1 = sld [smem:[#allocation4_spill]] (!%p768_p2)  ;;  %s7394_s11 = sld [smem:[#allocation13_spill]] (!%p768_p2) }
  0x18   : > { %v6142_v0 = vld [vmem:[%s7380_s3] sm:$0xff] (!%p768_p2)  ;;  %s7384_s3 = sld [smem:[#allocation2_spill]] (!%p768_p2) }
  0x19   : > { %v6147_v1 = vld [vmem:[%s7381_s0 + $0x60] sm:$0xff] (!%p768_p2)  ;;  %4935 = vmatprep.mubr.msk.f32.mxu0 (!%p768_p2), %vm910_vm0, %v6142_v0  ;;  %v4715_v5 = vld [vmem:[%s7381_s0 + $0xf8] sm:$0xff] (!%p768_p2) }
  0x1a   : > { %v904_v2 = vld [vmem:[%s7382_s2] sm:$0xff]  ;;  %4969 = vmatprep.mubr.msk.f32.mxu1 %vm910_vm0, %v6147_v1  ;;  %s7397_s5 = smov (!%p851_p3, %s4470_s5), 1  ;;  %s7393_s2 = sld [smem:[#allocation11_spill]] }
  0x1b   : > { %907 = vperm.xlu0 %5958, %v904_v2   ;;  %s5945_s7 = smul.u32 304, %s7397_s5  ;;  %v1084_v4 = vld [vmem:[%s7383_s4] sm:$0xff]  ;;  %v3000_v6 = vld [vmem:[%s7387_s29 + $0x8] sm:$0xff]  ;;  %s7388_s4 = sld [smem:[#allocation7_spill]] }
  0x1c   : > { %s7365_s12 = sshll.u32 %s7397_s5, 4 }
  0x1d   : > { %s860_s9 = scalar_lea.vmem %s7356_s26, %s7365_s12 }
  0x1e   : > { %s6165_s6 = scalar_lea.vmem %s7384_s3, %s5945_s7 }
  0x1f   : > { %v887_v7 = vld [vmem:[%s6165_s6 + $0x98] sm:$0xff]  ;;  %v888_v8 = vld [vmem:[%s6165_s6 + $0xa0] sm:$0xff]  ;;  %1087 = vperm.xlu0 %5958, %v1084_v4   ;;  %v889_v12 = vld [vmem:[%s6165_s6 + $0xa8] sm:$0xff] }
  0x20   : > { %v871_v9 = vld [vmem:[%s6165_s6 + $0x18] sm:$0xff]  ;;  %v6179_v10 = vpack.c.bf16 %v888_v8, %v887_v7  ;;  %v872_v11 = vld [vmem:[%s6165_s6 + $0x20] sm:$0xff]  ;;  %v890_v13 = vld [vmem:[%s6165_s6 + $0xb0] sm:$0xff] }
  0x21   : > { %v6184_v14 = vpack.c.bf16 %v872_v11, %v871_v9  ;;  %v6186_v15 = vpack.c.bf16 %v890_v13, %v889_v12  ;;  %v873_v16 = vld [vmem:[%s6165_s6 + $0x28] sm:$0xff]  ;;  %v874_v17 = vld [vmem:[%s6165_s6 + $0x30] sm:$0xff]  ;;  %v891_v18 = vld [vmem:[%s6165_s6 + $0xb8] sm:$0xff] }
  0x22   : > { %5342 = vmatprep.subr.msk.bf16.mxu0 %vm6169_vm1, %v6179_v10  ;;  %v892_v19 = vld [vmem:[%s6165_s6 + $0xc0] sm:$0xff]  ;;  %v6201_v20 = vpack.c.bf16 %v874_v17, %v873_v16  ;;  %v1184_v22 = vld [vmem:[%s6165_s6 + $0x97] sm:$0xff]  ;;  %v1187_v29 = vld [vmem:[%s6165_s6 + $0xaf] sm:$0xff] }
  0x23   : > { %5345 = vmatpush3.bf16.xpose.msk.msra.mxu0 %vm6169_vm1, %v6184_v14  ;;  %3010 = vperm.xlu0 %5958, %v3000_v6   ;;  %v6203_v21 = vpack.c.bf16 %v892_v19, %v891_v18  ;;  %v1185_v23 = vld [vmem:[%s6165_s6 + $0x9f] sm:$0xff]  ;;  %v1168_v24 = vld [vmem:[%s6165_s6 + $0x17] sm:$0xff]  ;;  %v1186_v28 = vld [vmem:[%s6165_s6 + $0xa7] sm:$0xff] }
  0x24   : > { %5348 = vmatprep.subr.msk.bf16.mxu0 %vm6169_vm1, %v6186_v15  ;;  %v1169_v25 = vld [vmem:[%s6165_s6 + $0x1f] sm:$0xff]  ;;  %v6212_v26 = vpack.c.bf16 %v1185_v23, %v1184_v22  ;;  %v6223_v32 = vpack.c.bf16 %v1187_v29, %v1186_v28  ;;  %v893_v33 = vld [vmem:[%s6165_s6 + $0xc8] sm:$0xff]  ;;  %v894_v34 = vld [vmem:[%s6165_s6 + $0xd0] sm:$0xff] }
  0x25   : > { %v6214_v27 = vpack.c.bf16 %v1169_v25, %v1168_v24  ;;  %v875_v30 = vld [vmem:[%s6165_s6 + $0x38] sm:$0xff]  ;;  %v876_v31 = vld [vmem:[%s6165_s6 + $0x40] sm:$0xff]  ;;  %v1171_v37 = vld [vmem:[%s6165_s6 + $0x2f] sm:$0xff]  ;;  %v6240_v38 = vpack.c.bf16 %v894_v34, %v893_v33 }
  0x26   : > { %5390 = vmatprep.subr.msk.bf16.mxu1 %vm6169_vm1, %v6212_v26  ;;  %v6233_v35 = vpack.c.bf16 %v876_v31, %v875_v30  ;;  %v1170_v36 = vld [vmem:[%s6165_s6 + $0x27] sm:$0xff]  ;;  %v1188_v39 = vld [vmem:[%s6165_s6 + $0xb7] sm:$0xff]  ;;  %v1189_v40 = vld [vmem:[%s6165_s6 + $0xbf] sm:$0xff] }
  0x27   : > { %5393 = vmatpush3.bf16.xpose.msk.msra.mxu1 %vm6169_vm1, %v6214_v27  ;;  %v6244_v41 = vpack.c.bf16 %v1171_v37, %v1170_v36  ;;  %v6249_v42 = vpack.c.bf16 %v1189_v40, %v1188_v39  ;;  %v877_v43 = vld [vmem:[%s6165_s6 + $0x48] sm:$0xff]  ;;  %v878_v44 = vld [vmem:[%s6165_s6 + $0x50] sm:$0xff]  ;;  %v895_v45 = vld [vmem:[%s6165_s6 + $0xd8] sm:$0xff] }
  0x28   : > { %5396 = vmatprep.subr.msk.bf16.mxu1 %vm6169_vm1, %v6223_v32  ;;  %v896_v46 = vld [vmem:[%s6165_s6 + $0xe0] sm:$0xff]  ;;  %v6261_v47 = vpack.c.bf16 %v878_v44, %v877_v43  ;;  %v1172_v48 = vld [vmem:[%s6165_s6 + $0x37] sm:$0xff]  ;;  %v1191_v52 = vld [vmem:[%s6165_s6 + $0xcf] sm:$0xff] }
  0x29   : > { %v1173_v49 = vld [vmem:[%s6165_s6 + $0x3f] sm:$0xff]  ;;  %v6268_v50 = vpack.c.bf16 %v896_v46, %v895_v45  ;;  %v1190_v51 = vld [vmem:[%s6165_s6 + $0xc7] sm:$0xff]  ;;  %v898_v58 = vld [vmem:[%s6165_s6 + $0xf0] sm:$0xff] }
  0x2a   : > { %v6272_v53 = vpack.c.bf16 %v1173_v49, %v1172_v48  ;;  %v6277_v54 = vpack.c.bf16 %v1191_v52, %v1190_v51  ;;  %v879_v55 = vld [vmem:[%s6165_s6 + $0x58] sm:$0xff]  ;;  %v880_v56 = vld [vmem:[%s6165_s6 + $0x60] sm:$0xff]  ;;  %v897_v57 = vld [vmem:[%s6165_s6 + $0xe8] sm:$0xff] }
  0x2b   : > { %5351 = vmatpush3.bf16.xpose.msk.msra.mxu0 %vm6169_vm1, %v6201_v20  ;;  %v6289_v59 = vpack.c.bf16 %v880_v56, %v879_v55  ;;  %v1174_v60 = vld [vmem:[%s6165_s6 + $0x47] sm:$0xff]  ;;  %v1175_v61 = vld [vmem:[%s6165_s6 + $0x4f] sm:$0xff]  ;;  %v6296_v62 = vpack.c.bf16 %v898_v58, %v897_v57  ;;  %v1192_v63 = vld [vmem:[%s6165_s6 + $0xd7] sm:$0xff] }
  0x2c   : > { %5354 = vmatprep.subr.msk.bf16.mxu0 %vm6169_vm1, %v6203_v21  ;;  %v1193_v2 = vld [vmem:[%s6165_s6 + $0xdf] sm:$0xff]  ;;  %v6300_v3 = vpack.c.bf16 %v1175_v61, %v1174_v60  ;;  %v881_v6 = vld [vmem:[%s6165_s6 + $0x68] sm:$0xff]  ;;  %v882_v7 = vld [vmem:[%s6165_s6 + $0x70] sm:$0xff] }
  0x2d   : > { %v6305_v4 = vpack.c.bf16 %v1193_v2, %v1192_v63  ;;  %v899_v8 = vld [vmem:[%s6165_s6 + $0xf8] sm:$0xff]  ;;  %v900_v9 = vld [vmem:[%s6165_s6 + $0x100] sm:$0xff]  ;;  %v6317_v11 = vpack.c.bf16 %v882_v7, %v881_v6  ;;  %v1195_v18 = vld [vmem:[%s6165_s6 + $0xef] sm:$0xff] }
  0x2e   : > { %v1176_v12 = vld [vmem:[%s6165_s6 + $0x57] sm:$0xff]  ;;  %v1177_v13 = vld [vmem:[%s6165_s6 + $0x5f] sm:$0xff]  ;;  %v6324_v16 = vpack.c.bf16 %v900_v9, %v899_v8  ;;  %v1194_v17 = vld [vmem:[%s6165_s6 + $0xe7] sm:$0xff] }
  0x2f   : > { %5399 = vmatpush3.bf16.xpose.msk.msra.mxu1 %vm6169_vm1, %v6244_v41  ;;  %v6328_v19 = vpack.c.bf16 %v1177_v13, %v1176_v12  ;;  %v6333_v22 = vpack.c.bf16 %v1195_v18, %v1194_v17  ;;  %v883_v23 = vld [vmem:[%s6165_s6 + $0x78] sm:$0xff]  ;;  %v884_v24 = vld [vmem:[%s6165_s6 + $0x80] sm:$0xff]  ;;  %v901_v25 = vld [vmem:[%s6165_s6 + $0x108] sm:$0xff] }
  0x30   : > { %5402 = vmatprep.subr.msk.bf16.mxu1 %vm6169_vm1, %v6249_v42  ;;  %v902_v28 = vld [vmem:[%s6165_s6 + $0x110] sm:$0xff]  ;;  %v6345_v29 = vpack.c.bf16 %v884_v24, %v883_v23  ;;  %v1178_v30 = vld [vmem:[%s6165_s6 + $0x67] sm:$0xff]  ;;  %v1197_v36 = vld [vmem:[%s6165_s6 + $0xff] sm:$0xff] }
  0x31   : > { %v1179_v31 = vld [vmem:[%s6165_s6 + $0x6f] sm:$0xff]  ;;  %v6352_v33 = vpack.c.bf16 %v902_v28, %v901_v25  ;;  %v1196_v34 = vld [vmem:[%s6165_s6 + $0xf7] sm:$0xff]  ;;  %v1181_v46 = vld [vmem:[%s6165_s6 + $0x7f] sm:$0xff] }
  0x32   : > { %v6356_v37 = vpack.c.bf16 %v1179_v31, %v1178_v30  ;;  %v6361_v39 = vpack.c.bf16 %v1197_v36, %v1196_v34  ;;  %v885_v40 = vld [vmem:[%s6165_s6 + $0x88] sm:$0xff]  ;;  %v886_v43 = vld [vmem:[%s6165_s6 + $0x90] sm:$0xff]  ;;  %v1198_v2 = vld [vmem:[%s7381_s0] sm:$0xff] }
  0x33   : > { %5357 = vmatpush3.bf16.xpose.msk.msra.mxu0 %vm6169_vm1, %v6233_v35  ;;  %v6371_v44 = vpack.c.bf16 %v886_v43, %v885_v40  ;;  %v1180_v45 = vld [vmem:[%s6165_s6 + $0x77] sm:$0xff]  ;;  %v1202_v48 = vld [vmem:[%s6165_s6 + $0x107] sm:$0xff]  ;;  %v1203_v49 = vld [vmem:[%s6165_s6 + $0x10f] sm:$0xff] }
  0x34   : > { %5360 = vmatprep.subr.msk.bf16.mxu0 %vm6169_vm1, %v6240_v38  ;;  %v6380_v51 = vpack.c.bf16 %v1181_v46, %v1180_v45  ;;  %v6385_v52 = vpack.c.bf16 %v1203_v49, %v1202_v48  ;;  %v1182_v55 = vld [vmem:[%s6165_s6 + $0x87] sm:$0xff]  ;;  %v1183_v56 = vld [vmem:[%s6165_s6 + $0x8f] sm:$0xff]  ;;  %v1201_v6 = vld [vmem:[%s7381_s0 + $0x18] sm:$0xff] }
  0x35   : > { %v6397_v57 = vpack.c.bf16 %v1183_v56, %v1182_v55  ;;  %v1166_v58 = vld [vmem:[%s6165_s6 + $0x7] sm:$0xff]  ;;  %v1167_v60 = vld [vmem:[%s6165_s6 + $0xf] sm:$0xff]  ;;  %v2383_v9 = vld [vmem:[%s6165_s6 + $0x19] sm:$0xff] }
  0x36   : > { %v5439_v61 = vpack.c.bf16 %v1167_v60, %v1166_v58  ;;  %v4517_v63 = vld [vmem:[%s7381_s0 + $0x68] sm:$0xff]  ;;  %v2402_v17 = vld [vmem:[%s6165_s6 + $0xb1] sm:$0xff]  ;;  %v2403_v25 = vld [vmem:[%s6165_s6 + $0xb9] sm:$0xff] }
  0x37   : > { %5405 = vmatpush3.bf16.xpose.msk.msra.mxu1 %vm6169_vm1, %v6272_v53  ;;  %v2400_v7 = vld [vmem:[%s6165_s6 + $0xa1] sm:$0xff]  ;;  %v2401_v13 = vld [vmem:[%s6165_s6 + $0xa9] sm:$0xff]  ;;  %v2386_v23 = vld [vmem:[%s6165_s6 + $0x31] sm:$0xff] }
  0x38   : > { %5408 = vmatprep.subr.msk.bf16.mxu1 %vm6169_vm1, %v6277_v54  ;;  %v2384_v12 = vld [vmem:[%s6165_s6 + $0x21] sm:$0xff]  ;;  %v4594_v24 = vld [vmem:[%s7381_s0 + $0xd0] sm:$0xff]  ;;  %v4595_v34 = vld [vmem:[%s7381_s0 + $0xd8] sm:$0xff] }
  0x39   : > { %v6553_v18 = vpack.c.bf16 %v2384_v12, %v2383_v9  ;;  %v2404_v28 = vld [vmem:[%s6165_s6 + $0xc1] sm:$0xff]  ;;  %v2387_v36 = vld [vmem:[%s6165_s6 + $0x39] sm:$0xff]  ;;  %v2405_v40 = vld [vmem:[%s6165_s6 + $0xc9] sm:$0xff] }
  0x3a   : > { %v6579_v31 = vpack.c.bf16 %v2404_v28, %v2403_v25  ;;  %v2406_v43 = vld [vmem:[%s6165_s6 + $0xd1] sm:$0xff]  ;;  %v2389_v48 = vld [vmem:[%s6165_s6 + $0x49] sm:$0xff]  ;;  %v2392_v58 = vld [vmem:[%s6165_s6 + $0x61] sm:$0xff] }
  0x3b   : > { %5363 = vmatpush3.bf16.xpose.msk.msra.mxu0 %vm6169_vm1, %v6261_v47  ;;  %v6603_v46 = vpack.c.bf16 %v2406_v43, %v2405_v40  ;;  %v2390_v49 = vld [vmem:[%s6165_s6 + $0x51] sm:$0xff]  ;;  %v2409_v60 = vld [vmem:[%s6165_s6 + $0xe9] sm:$0xff]  ;;  %v4752_v43 = vld [vmem:[%s7381_s0 + $0x40] sm:$0xff] }
  0x3c   : > { %5366 = vmatprep.subr.msk.bf16.mxu0 %vm6169_vm1, %v6268_v50  ;;  %v6615_v55 = vpack.c.bf16 %v2390_v49, %v2389_v48  ;;  %v2397_v12 = vld [vmem:[%s6165_s6 + $0x89] sm:$0xff]  ;;  %v4759_v28 = vld [vmem:[%s7381_s0 + $0xb8] sm:$0xff] }
  0x3d   : > { %v4758_v25 = vld [vmem:[%s7381_s0 + $0xb0] sm:$0xff] }
  0x3f   : > { %5411 = vmatpush3.bf16.xpose.msk.msra.mxu1 %vm6169_vm1, %v6300_v3 }
  0x40   : > { %5414 = vmatprep.subr.msk.bf16.mxu1 %vm6169_vm1, %v6305_v4 }
  0x43   : > { %5369 = vmatpush3.bf16.xpose.msk.msra.mxu0 %vm6169_vm1, %v6289_v59 }
  0x44   : > { %5372 = vmatprep.subr.msk.bf16.mxu0 %vm6169_vm1, %v6296_v62 }
  0x47   : > { %5417 = vmatpush3.bf16.xpose.msk.msra.mxu1 %vm6169_vm1, %v6328_v19 }
  0x48   : > { %5420 = vmatprep.subr.msk.bf16.mxu1 %vm6169_vm1, %v6333_v22 }
  0x4b   : > { %5375 = vmatpush3.bf16.xpose.msk.msra.mxu0 %vm6169_vm1, %v6317_v11 }
  0x4c   : > { %5378 = vmatprep.subr.msk.bf16.mxu0 %vm6169_vm1, %v6324_v16 }
  0x4f   : > { %5423 = vmatpush3.bf16.xpose.msk.msra.mxu1 %vm6169_vm1, %v6356_v37 }
  0x50   : > { %5426 = vmatprep.subr.msk.bf16.mxu1 %vm6169_vm1, %v6361_v39 }
  0x53   : > { %5381 = vmatpush3.bf16.xpose.msk.msra.mxu0 %vm6169_vm1, %v6345_v29 }
  0x54   : > { %5384 = vmatprep.subr.msk.bf16.mxu0 %vm6169_vm1, %v6352_v33 }
  0x57   : > { %5429 = vmatpush3.bf16.xpose.msk.msra.mxu1 %vm6169_vm1, %v6380_v51 }
  0x58   : > { %5432 = vmatprep.subr.msk.bf16.mxu1 %vm6169_vm1, %v6385_v52 }
  0x5b   : > { %5387 = vmatpush3.bf16.xpose.msk.msra.mxu0 %vm6169_vm1, %v6371_v44 }
  0x5f   : > { %5435 = vmatpush3.bf16.xpose.msk.msra.mxu1 %vm6169_vm1, %v6397_v57 }
  0x60   : > { %5438 = vmatprep.subr.msk.bf16.mxu1 %vm6169_vm1, %v6397_v57 }
  0x62   : > { %4936 = vmatmul.mubr.msk.f32.vlgmr.msra.gmra.mrb[0].mxu0 %vm910_vm0, %v6142_v0  ;;  %v4518_v0 = vld [vmem:[%s7381_s0 + $0x70] sm:$0xff] }
  0x66   : > { %4970 = vmatmul.mubr.msk.f32.vlgmr.msra.gmra.mrb[0].mxu1 %vm910_vm0, %v6147_v1  ;;  %v4519_v1 = vld [vmem:[%s7381_s0 + $0x78] sm:$0xff] }
  0x67   : > { %5441 = vmatpush3.bf16.xpose.msk.msra.mxu1 %vm6169_vm1, %v5439_v61  ;;  %4971 = vmatprep.mubr.msk.f32.mxu1 %vm910_vm0, %v4517_v63  ;;  %v2410_v61 = vld [vmem:[%s6165_s6 + $0xf1] sm:$0xff] }
  0x68   : > { %5444 = vmatprep.subr.msk.bf16.mxu1 %vm6169_vm1, %v6212_v26 }
  0x6a   : > { %4972 = vmatmul.mubr.msk.f32.gmra.mrb[2].mxu1 %vm910_vm0, %v4517_v63 }
  0x6b   : > { %4973 = vmatprep.mubr.msk.f32.mxu1 %vm910_vm0, %v4518_v0 }
  0x6e   : > { %4974 = vmatmul.mubr.msk.f32.gmra.mrb[4].mxu1 %vm910_vm0, %v4518_v0  ;;  %v6631_v0 = vpack.c.bf16 %v2410_v61, %v2409_v60 }
  0x6f   : > { %5447 = vmatpush3.bf16.xpose.msk.msra.mxu1 %vm6169_vm1, %v6214_v27  ;;  %4975 = vmatprep.mubr.msk.f32.mxu1 %vm910_vm0, %v4519_v1  ;;  %v1199_v27 = vld [vmem:[%s7381_s0 + $0x8] sm:$0xff] }
  0x70   : > { %5450 = vmatprep.subr.msk.bf16.mxu1 %vm6169_vm1, %v6223_v32 }
  0x72   : > { %4976 = vmatmul.mubr.msk.f32.gmra.mrb[6].mxu1 %vm910_vm0, %v4519_v1  ;;  %v2393_v1 = vld [vmem:[%s6165_s6 + $0x69] sm:$0xff] }
  0x73   : > { %5009 = vmatprep.mubr.msk.f32.mxu1 %vm910_vm0, %v1198_v2 }
  0x77   : > { %5453 = vmatpush3.bf16.xpose.msk.msra.mxu1 %vm6169_vm1, %v6244_v41 }
  0x78   : > { %5456 = vmatprep.subr.msk.bf16.mxu1 %vm6169_vm1, %v6249_v42 }
  0x7f   : > { %5459 = vmatpush3.bf16.xpose.msk.msra.mxu1 %vm6169_vm1, %v6272_v53 }
  0x80   : > { %5462 = vmatprep.subr.msk.bf16.mxu1 %vm6169_vm1, %v6277_v54 }
  0x87   : > { %5465 = vmatpush3.bf16.xpose.msk.msra.mxu1 %vm6169_vm1, %v6300_v3 }
  0x88   : > { %5468 = vmatprep.subr.msk.bf16.mxu1 %vm6169_vm1, %v6305_v4 }
  0x8f   : > { %5471 = vmatpush3.bf16.xpose.msk.msra.mxu1 %vm6169_vm1, %v6328_v19 }
  0x90   : > { %5474 = vmatprep.subr.msk.bf16.mxu1 %vm6169_vm1, %v6333_v22 }
  0x97   : > { %5477 = vmatpush3.bf16.xpose.msk.msra.mxu1 %vm6169_vm1, %v6356_v37 }
  0x98   : > { %5480 = vmatprep.subr.msk.bf16.mxu1 %vm6169_vm1, %v6361_v39 }
  0x9f   : > { %5483 = vmatpush3.bf16.xpose.msk.msra.mxu1 %vm6169_vm1, %v6380_v51 }
  0xa0   : > { %5486 = vmatprep.subr.msk.bf16.mxu1 %vm6169_vm1, %v6223_v32  ;;  %v1200_v32 = vld [vmem:[%s7381_s0 + $0x10] sm:$0xff] }
  0xa6   : > { %5010 = vmatmul.mubr.msk.f32.vlgmr.msra.gmra.mrb[0].mxu1 %vm910_vm0, %v1198_v2  ;;  %v2394_v2 = vld [vmem:[%s6165_s6 + $0x71] sm:$0xff] }
  0xa7   : > { %5489 = vmatpush3.bf16.xpose.msk.msra.mxu1 %vm6169_vm1, %v6244_v41  ;;  %5011 = vmatprep.mubr.msk.f32.mxu1 %vm910_vm0, %v1199_v27  ;;  %v4592_v41 = vld [vmem:[%s7381_s0 + $0xc0] sm:$0xff] }
  0xa8   : > { %5492 = vmatprep.subr.msk.bf16.mxu1 %vm6169_vm1, %v6249_v42  ;;  %v5983_v42 = vmov 0.0  }
  0xa9   : > { %1157 = vmatprep.mubr.f32.mxu0 %v5983_v42 }
  0xaa   : > { %5012 = vmatmul.mubr.msk.f32.gmra.mrb[2].mxu1 %vm910_vm0, %v1199_v27  ;;  %v2411_v27 = vld [vmem:[%s6165_s6 + $0xf9] sm:$0xff] }
  0xab   : > { %5013 = vmatprep.mubr.msk.f32.mxu1 %vm910_vm0, %v1200_v32 }
  0xae   : > { %5014 = vmatmul.mubr.msk.f32.gmra.mrb[4].mxu1 %vm910_vm0, %v1200_v32  ;;  %v2412_v32 = vld [vmem:[%s6165_s6 + $0x101] sm:$0xff] }
  0xaf   : > { %5495 = vmatpush3.bf16.xpose.msk.msra.mxu1 %vm6169_vm1, %v6272_v53  ;;  %5015 = vmatprep.mubr.msk.f32.mxu1 %vm910_vm0, %v1201_v6  ;;  %v1543_v53 = vld [vmem:[%s6165_s6 + $0x117] sm:$0xff] }
  0xb0   : > { %5498 = vmatprep.subr.msk.bf16.mxu1 %vm6169_vm1, %v6277_v54  ;;  %v1544_v54 = vld [vmem:[%s6165_s6 + $0x11f] sm:$0xff] }
  0xb2   : > { %5016 = vmatmul.mubr.msk.f32.gmra.mrb[6].mxu1 %vm910_vm0, %v1201_v6  ;;  %v6643_v6 = vpack.c.bf16 %v2394_v2, %v2393_v1  ;;  %v2136_v1 = vld [vmem:[%s6165_s6 + $0x50] sm:$0xff]  ;;  %v4712_v2 = vld [vmem:[%s7381_s0 + $0xe0] sm:$0xff] }
  0xb3   : > { %5049 = vmatprep.mubr.msk.f32.mxu1 %vm910_vm0, %v4592_v41 }
  0xb7   : > { %5501 = vmatpush3.bf16.xpose.msk.msra.mxu1 %vm6169_vm1, %v6300_v3  ;;  %v5526_v3 = vpack.c.bf16 %v1544_v54, %v1543_v53  ;;  %v2395_v53 = vld [vmem:[%s6165_s6 + $0x79] sm:$0xff]  ;;  %v2396_v54 = vld [vmem:[%s6165_s6 + $0x81] sm:$0xff] }
  0xb8   : > { %5504 = vmatprep.subr.msk.bf16.mxu1 %vm6169_vm1, %v6305_v4  ;;  %v2399_v4 = vld [vmem:[%s6165_s6 + $0x99] sm:$0xff] }
  0xb9   : > { %v6541_v8 = vpack.c.bf16 %v2400_v7, %v2399_v4  ;;  %v2419_v4 = vld [vmem:[%s6165_s6 + $0x111] sm:$0xff]  ;;  %v6657_v7 = vpack.c.bf16 %v2396_v54, %v2395_v53 }
  0xba   : > { %v2137_v54 = vld [vmem:[%s6165_s6 + $0x58] sm:$0xff] }
  0xbf   : > { %5507 = vmatpush3.bf16.xpose.msk.msra.mxu1 %vm6169_vm1, %v6328_v19  ;;  %v6555_v19 = vpack.c.bf16 %v2402_v17, %v2401_v13  ;;  %v2398_v13 = vld [vmem:[%s6165_s6 + $0x91] sm:$0xff] }
  0xc0   : > { %5510 = vmatprep.subr.msk.bf16.mxu1 %vm6169_vm1, %v6333_v22  ;;  %v4593_v22 = vld [vmem:[%s7381_s0 + $0xc8] sm:$0xff]  ;;  %v6669_v17 = vpack.c.bf16 %v2398_v13, %v2397_v12 }
  0xc1   : > { %v2139_v13 = vld [vmem:[%s6165_s6 + $0x68] sm:$0xff] }
  0xc7   : > { %5513 = vmatpush3.bf16.xpose.msk.msra.mxu1 %vm6169_vm1, %v6356_v37  ;;  %v2388_v37 = vld [vmem:[%s6165_s6 + $0x41] sm:$0xff] }
  0xc8   : > { %5516 = vmatprep.subr.msk.bf16.mxu1 %vm6169_vm1, %v6361_v39  ;;  %v4756_v39 = vld [vmem:[%s7381_s0 + $0xa0] sm:$0xff]  ;;  %v6600_v45 = vpack.c.bf16 %v2388_v37, %v2387_v36 }
  0xcf   : > { %5519 = vmatpush3.bf16.xpose.msk.msra.mxu1 %vm6169_vm1, %v6380_v51  ;;  %v2407_v51 = vld [vmem:[%s6165_s6 + $0xd9] sm:$0xff] }
  0xd0   : > { %5522 = vmatprep.subr.msk.bf16.mxu1 %vm6169_vm1, %v6385_v52  ;;  %v2408_v52 = vld [vmem:[%s6165_s6 + $0xe1] sm:$0xff] }
  0xd1   : > { %v6617_v56 = vpack.c.bf16 %v2408_v52, %v2407_v51  ;;  %v1083_v51 = vld [vmem:[%s7388_s4] sm:$0xff]  ;;  %v4753_v52 = vld [vmem:[%s7381_s0 + $0x48] sm:$0xff]  ;;  %s7389_s4 = sld [smem:[#allocation12_spill]] }
  0xd7   : > { %5525 = vmatpush3.bf16.xpose.msk.msra.mxu1 %vm6169_vm1, %v6397_v57  ;;  %v2391_v57 = vld [vmem:[%s6165_s6 + $0x59] sm:$0xff] }
  0xd8   : > { %5528 = vmatprep.subr.msk.bf16.mxu1 %vm6169_vm1, %v5526_v3  ;;  %v6629_v63 = vpack.c.bf16 %v2392_v58, %v2391_v57  ;;  %v2418_v3 = vld [vmem:[%s6165_s6 + $0x109] sm:$0xff] }
  0xd9   : > { %v6659_v9 = vpack.c.bf16 %v2419_v4, %v2418_v3  ;;  %v4637_v57 = vld [vmem:[%s7381_s0 + $0x88] sm:$0xff]  ;;  %v2138_v3 = vld [vmem:[%s6165_s6 + $0x60] sm:$0xff] }
  0xda   : > { %v2155_v4 = vld [vmem:[%s6165_s6 + $0xe8] sm:$0xff] }
  0xdf   : > { %5531 = vmatpush3.bf16.xpose.msk.msra.mxu1 %vm6169_vm1, %v6212_v26  ;;  %v2385_v26 = vld [vmem:[%s6165_s6 + $0x29] sm:$0xff] }
  0xe0   : > { %5678 = vmatprep.subr.msk.bf16.mxu1 %vm6169_vm1, %v6541_v8  ;;  %v6576_v30 = vpack.c.bf16 %v2386_v23, %v2385_v26  ;;  %v2382_v26 = vld [vmem:[%s6165_s6 + $0x11] sm:$0xff] }
  0xe6   : > { %5050 = vmatmul.mubr.msk.f32.vlgmr.msra.gmra.mrb[0].mxu1 %vm910_vm0, %v4592_v41  ;;  %v6645_v41 = vpack.c.bf16 %v2412_v32, %v2411_v27  ;;  %v2153_v32 = vld [vmem:[%s6165_s6 + $0xd8] sm:$0xff] }
  0xe7   : > { %5681 = vmatpush3.bf16.xpose.msk.msra.mxu1 %vm6169_vm1, %v6553_v18  ;;  %5051 = vmatprep.mubr.msk.f32.mxu1 %vm910_vm0, %v4593_v22 }
  0xe8   : > { %5684 = vmatprep.subr.msk.bf16.mxu1 %vm6169_vm1, %v6555_v19 }
  0xea   : > { %5052 = vmatmul.mubr.msk.f32.gmra.mrb[2].mxu1 %vm910_vm0, %v4593_v22  ;;  %v2381_v22 = vld [vmem:[%s6165_s6 + $0x9] sm:$0xff] }
  0xeb   : > { %5053 = vmatprep.mubr.msk.f32.mxu1 %vm910_vm0, %v4594_v24  ;;  %v5727_v23 = vpack.c.bf16 %v2382_v26, %v2381_v22  ;;  %v2157_v22 = vld [vmem:[%s6165_s6 + $0xf8] sm:$0xff]  ;;  %v2158_v26 = vld [vmem:[%s6165_s6 + $0x100] sm:$0xff] }
  0xee   : > { %5054 = vmatmul.mubr.msk.f32.gmra.mrb[4].mxu1 %vm910_vm0, %v4594_v24  ;;  %v4757_v24 = vld [vmem:[%s7381_s0 + $0xa8] sm:$0xff] }
  0xef   : > { %5687 = vmatpush3.bf16.xpose.msk.msra.mxu1 %vm6169_vm1, %v6576_v30  ;;  %5055 = vmatprep.mubr.msk.f32.mxu1 %vm910_vm0, %v4595_v34 }
  0xf0   : > { %5690 = vmatprep.subr.msk.bf16.mxu1 %vm6169_vm1, %v6579_v31 }
  0xf2   : > { %5056 = vmatmul.mubr.msk.f32.gmra.mrb[6].mxu1 %vm910_vm0, %v4595_v34  ;;  %v908_v34 = vpop.permute.xlu0 %907 }
  0xf3   : > { %5209 = vmatprep.mubr.msk.f32.mxu1 %vm910_vm0, %v4756_v39 }
  0xf7   : > { %5693 = vmatpush3.bf16.xpose.msk.msra.mxu1 %vm6169_vm1, %v6600_v45 }
  0xf8   : > { %5696 = vmatprep.subr.msk.bf16.mxu1 %vm6169_vm1, %v6603_v46 }
  0xff   : > { %5699 = vmatpush3.bf16.xpose.msk.msra.mxu1 %vm6169_vm1, %v6615_v55 }
 0x100   : > { %5702 = vmatprep.subr.msk.bf16.mxu1 %vm6169_vm1, %v6617_v56 }
 0x107   : > { %5705 = vmatpush3.bf16.xpose.msk.msra.mxu1 %vm6169_vm1, %v6629_v63 }
 0x108   : > { %5708 = vmatprep.subr.msk.bf16.mxu1 %vm6169_vm1, %v6631_v0 }
 0x10f   : > { %5711 = vmatpush3.bf16.xpose.msk.msra.mxu1 %vm6169_vm1, %v6643_v6 }
 0x110   : > { %5714 = vmatprep.subr.msk.bf16.mxu1 %vm6169_vm1, %v6645_v41 }
 0x117   : > { %5717 = vmatpush3.bf16.xpose.msk.msra.mxu1 %vm6169_vm1, %v6657_v7 }
 0x118   : > { %5720 = vmatprep.subr.msk.bf16.mxu1 %vm6169_vm1, %v6659_v9 }
 0x11f   : > { %5723 = vmatpush3.bf16.xpose.msk.msra.mxu1 %vm6169_vm1, %v6669_v17 }
 0x120   : > { %5726 = vmatprep.subr.msk.bf16.mxu1 %vm6169_vm1, %v6669_v17 }
 0x126   : > { %5210 = vmatmul.mubr.msk.f32.vlgmr.msra.gmra.mrb[8].mxu1 %vm910_vm0, %v4756_v39 }
 0x127   : > { %5729 = vmatpush3.bf16.xpose.msk.msra.mxu1 %vm6169_vm1, %v5727_v23  ;;  %5211 = vmatprep.mubr.msk.f32.mxu1 %vm910_vm0, %v4757_v24 }
 0x128   : > { %5732 = vmatprep.subr.msk.bf16.mxu1 %vm6169_vm1, %v6541_v8 }
 0x12a   : > { %5212 = vmatmul.mubr.msk.f32.gmra.mrb[10].mxu1 %vm910_vm0, %v4757_v24  ;;  %v5658_v24 = vpack.c.bf16 %v2158_v26, %v2157_v22 }
 0x12b   : > { %5213 = vmatprep.mubr.msk.f32.mxu1 %vm910_vm0, %v4758_v25 }
 0x12e   : > { %5214 = vmatmul.mubr.msk.f32.gmra.mrb[12].mxu1 %vm910_vm0, %v4758_v25  ;;  %v2141_v25 = vld [vmem:[%s6165_s6 + $0x78] sm:$0xff] }
 0x12f   : > { %5735 = vmatpush3.bf16.xpose.msk.msra.mxu1 %vm6169_vm1, %v6553_v18  ;;  %5215 = vmatprep.mubr.msk.f32.mxu1 %vm910_vm0, %v4759_v28  ;;  %v4636_v18 = vld [vmem:[%s7381_s0 + $0x80] sm:$0xff] }
 0x130   : > { %5738 = vmatprep.subr.msk.bf16.mxu1 %vm6169_vm1, %v6555_v19 }
 0x132   : > { %5216 = vmatmul.mubr.msk.f32.gmra.mrb[14].mxu1 %vm910_vm0, %v4759_v28  ;;  %v2142_v28 = vld [vmem:[%s6165_s6 + $0x80] sm:$0xff] }
 0x133   : > { %5249 = vmatprep.mubr.msk.f32.mxu1 %vm910_vm0, %v4752_v43 }
 0x135   : > { %v1076_v36 = vpop.f32.mrb[0].mxu0 }
 0x136   : > { %v1077_v37 = vadd.f32 %v1076_v36, %v908_v34  ;;  %v1078_v39 = vpop.f32.mrb[1].mxu0  ;;  %v2160_v36 = vld [vmem:[%s6165_s6 + $0x110] sm:$0xff] }
 0x137   : > { %v1079_v40 = vadd.f32 %v1078_v39, %v908_v34  ;;  %5741 = vmatpush3.bf16.xpose.msk.msra.mxu1 %vm6169_vm1, %v6576_v30  ;;  %v2159_v34 = vld [vmem:[%s6165_s6 + $0x108] sm:$0xff] }
 0x138   : > { %v1081_v49 = vmax.f32 %v1077_v37, 0.0  ;;  %5744 = vmatprep.subr.msk.bf16.mxu1 %vm6169_vm1, %v6579_v31  ;;  %v5661_v37 = vpack.c.bf16 %v2142_v28, %v2141_v25  ;;  %v5664_v39 = vpack.c.bf16 %v2160_v36, %v2159_v34  ;;  %v3583_v28 = vld [vmem:[%s7348_s18] sm:$0xff] }
 0x139   : > { %v1082_v48 = vmax.f32 %v1079_v40, 0.0  ;;  %v2143_v40 = vld [vmem:[%s6165_s6 + $0x88] sm:$0xff] }
 0x13b   : > { %1093 = vmatprep.subr.mxu0 %v1082_v48  ;;  %v2161_v48 = vld [vmem:[%s6165_s6 + $0x118] sm:$0xff] }
 0x13c   : > { %1094 = vmatpush1.msra.mxu0 %v1081_v49  ;;  %v2162_v49 = vld [vmem:[%s6165_s6 + $0x120] sm:$0xff] }
 0x13d   : > { %4515 = vmatmul.mubr.msk.f32.vlgmr.msra.gmra.mrb[2].mxu0 %vm910_vm0, %v1083_v51  ;;  %5534 = vmatprep.subr.msk.bf16.mxu0 %vm6169_vm1, %v6179_v10 }
 0x13e   : > { %5089 = vmatprep.mubr.msk.f32.mxu0 %vm910_vm0, %v4636_v18 }
 0x13f   : > { %5747 = vmatpush3.bf16.xpose.msk.msra.mxu1 %vm6169_vm1, %v6600_v45 }
 0x140   : > { %5750 = vmatprep.subr.msk.bf16.mxu1 %vm6169_vm1, %v6603_v46 }
 0x143   : > { %5537 = vmatpush3.bf16.xpose.msk.msra.mxu0 %vm6169_vm1, %v6184_v14 }
 0x144   : > { %5540 = vmatprep.subr.msk.bf16.mxu0 %vm6169_vm1, %v6186_v15 }
 0x147   : > { %5753 = vmatpush3.bf16.xpose.msk.msra.mxu1 %vm6169_vm1, %v6615_v55 }
 0x148   : > { %5756 = vmatprep.subr.msk.bf16.mxu1 %vm6169_vm1, %v6617_v56 }
 0x14b   : > { %5543 = vmatpush3.bf16.xpose.msk.msra.mxu0 %vm6169_vm1, %v6201_v20 }
 0x14c   : > { %5546 = vmatprep.subr.msk.bf16.mxu0 %vm6169_vm1, %v6203_v21 }
 0x14f   : > { %5759 = vmatpush3.bf16.xpose.msk.msra.mxu1 %vm6169_vm1, %v6629_v63 }
 0x150   : > { %5762 = vmatprep.subr.msk.bf16.mxu1 %vm6169_vm1, %v6631_v0 }
 0x153   : > { %5549 = vmatpush3.bf16.xpose.msk.msra.mxu0 %vm6169_vm1, %v6233_v35 }
 0x154   : > { %5552 = vmatprep.subr.msk.bf16.mxu0 %vm6169_vm1, %v6240_v38 }
 0x157   : > { %5765 = vmatpush3.bf16.xpose.msk.msra.mxu1 %vm6169_vm1, %v6643_v6 }
 0x158   : > { %5768 = vmatprep.subr.msk.bf16.mxu1 %vm6169_vm1, %v6645_v41 }
 0x15b   : > { %5555 = vmatpush3.bf16.xpose.msk.msra.mxu0 %vm6169_vm1, %v6261_v47 }
 0x15c   : > { %5558 = vmatprep.subr.msk.bf16.mxu0 %vm6169_vm1, %v6268_v50 }
 0x15f   : > { %5771 = vmatpush3.bf16.xpose.msk.msra.mxu1 %vm6169_vm1, %v6657_v7 }
 0x160   : > { %5774 = vmatprep.subr.msk.bf16.mxu1 %vm6169_vm1, %v6555_v19  ;;  %v4754_v19 = vld [vmem:[%s7381_s0 + $0x50] sm:$0xff] }
 0x163   : > { %5561 = vmatpush3.bf16.xpose.msk.msra.mxu0 %vm6169_vm1, %v6289_v59 }
 0x164   : > { %5564 = vmatprep.subr.msk.bf16.mxu0 %vm6169_vm1, %v6296_v62 }
 0x166   : > { %5250 = vmatmul.mubr.msk.f32.vlgmr.msra.gmra.mrb[8].mxu1 %vm910_vm0, %v4752_v43  ;;  %v2144_v43 = vld [vmem:[%s6165_s6 + $0x90] sm:$0xff] }
 0x167   : > { %5777 = vmatpush3.bf16.xpose.msk.msra.mxu1 %vm6169_vm1, %v6576_v30  ;;  %5251 = vmatprep.mubr.msk.f32.mxu1 %vm910_vm0, %v4753_v52  ;;  %v4755_v30 = vld [vmem:[%s7381_s0 + $0x58] sm:$0xff]  ;;  %v5667_v51 = vpack.c.bf16 %v2144_v43, %v2143_v40  ;;  %v2971_v40 = vld [vmem:[%s7392_s1] sm:$0x3]  ;;  %s4902_s1 = sshll.u32 %s7397_s5, 6 }
 0x168   : > { %5780 = vmatprep.subr.msk.bf16.mxu1 %vm6169_vm1, %v6579_v31  ;;  %v4832_v31 = vld [vmem:[%s7381_s0 + $0x100] sm:$0xff]  ;;  %s7308_s30 = scalar_lea.vmem %s7358_s28, %s4902_s1 }
 0x16a   : > { %5252 = vmatmul.mubr.msk.f32.gmra.mrb[10].mxu1 %vm910_vm0, %v4753_v52  ;;  %v2145_v52 = vld [vmem:[%s6165_s6 + $0x98] sm:$0xff] }
 0x16b   : > { %5567 = vmatpush3.bf16.xpose.msk.msra.mxu0 %vm6169_vm1, %v6317_v11  ;;  %5253 = vmatprep.mubr.msk.f32.mxu1 %vm910_vm0, %v4754_v19 }
 0x16c   : > { %5570 = vmatprep.subr.msk.bf16.mxu0 %vm6169_vm1, %v6324_v16 }
 0x16e   : > { %5254 = vmatmul.mubr.msk.f32.gmra.mrb[12].mxu1 %vm910_vm0, %v4754_v19  ;;  %v2146_v19 = vld [vmem:[%s6165_s6 + $0xa0] sm:$0xff] }
 0x16f   : > { %5783 = vmatpush3.bf16.xpose.msk.msra.mxu1 %vm6169_vm1, %v6600_v45  ;;  %5255 = vmatprep.mubr.msk.f32.mxu1 %vm910_vm0, %v4755_v30  ;;  %v1784_v45 = vld [vmem:[%s6165_s6 + $0x10] sm:$0xff] }
 0x170   : > { %5786 = vmatprep.subr.msk.bf16.mxu1 %vm6169_vm1, %v6603_v46 }
 0x172   : > { %5256 = vmatmul.mubr.msk.f32.gmra.mrb[14].mxu1 %vm910_vm0, %v4755_v30  ;;  %v5673_v30 = vpack.c.bf16 %v2146_v19, %v2145_v52 }
 0x173   : > { %5573 = vmatpush3.bf16.xpose.msk.msra.mxu0 %vm6169_vm1, %v6345_v29  ;;  %5289 = vmatprep.mubr.msk.f32.mxu1 %vm910_vm0, %v4832_v31 }
 0x174   : > { %5576 = vmatprep.subr.msk.bf16.mxu0 %vm6169_vm1, %v6352_v33  ;;  %v1783_v33 = vld [vmem:[%s6165_s6 + $0x8] sm:$0xff] }
 0x175   : > { %v5583_v46 = vpack.c.bf16 %v1784_v45, %v1783_v33  ;;  %v4714_v33 = vld [vmem:[%s7381_s0 + $0xf0] sm:$0xff]  ;;  %v1088_v45 = vpop.permute.xlu0 %1087 }
 0x177   : > { %5789 = vmatpush3.bf16.xpose.msk.msra.mxu1 %vm6169_vm1, %v6615_v55  ;;  %v4632_v55 = vld [vmem:[%s7381_s0 + $0x20] sm:$0xff] }
 0x178   : > { %5792 = vmatprep.subr.msk.bf16.mxu1 %vm6169_vm1, %v6617_v56  ;;  %v2760_v56 = vld [vmem:[%s6165_s6 + $0x121] sm:$0xff] }
 0x17b   : > { %5579 = vmatpush3.bf16.xpose.msk.msra.mxu0 %vm6169_vm1, %v6371_v44 }
 0x17c   : > { %5582 = vmatprep.subr.msk.bf16.mxu0 %vm6169_vm1, %v6371_v44  ;;  %v4638_v44 = vld [vmem:[%s7381_s0 + $0x90] sm:$0xff] }
 0x17f   : > { %5795 = vmatpush3.bf16.xpose.msk.msra.mxu1 %vm6169_vm1, %v6629_v63 }
 0x180   : > { %5798 = vmatprep.subr.msk.bf16.mxu1 %vm6169_vm1, %v6631_v0  ;;  %v2135_v0 = vld [vmem:[%s6165_s6 + $0x48] sm:$0xff] }
 0x182   : > { %5090 = vmatmul.mubr.msk.f32.vlgmr.msra.gmra.mrb[4].mxu0 %vm910_vm0, %v4636_v18  ;;  %v5670_v18 = vpack.c.bf16 %v2162_v49, %v2161_v48  ;;  %v4220_v49 = vld [vmem:[%s7353_s23 + $0x10] sm:$0xff] }
 0x183   : > { %5585 = vmatpush3.bf16.xpose.msk.msra.mxu0 %vm6169_vm1, %v5583_v46  ;;  %5091 = vmatprep.mubr.msk.f32.mxu0 %vm910_vm0, %v4637_v57 }
 0x184   : > { %5588 = vmatprep.subr.msk.bf16.mxu0 %vm6169_vm1, %v6179_v10  ;;  %v4639_v10 = vld [vmem:[%s7381_s0 + $0x98] sm:$0xff] }
 0x186   : > { %5092 = vmatmul.mubr.msk.f32.gmra.mrb[6].mxu0 %vm910_vm0, %v4637_v57 }
 0x187   : > { %5093 = vmatprep.mubr.msk.f32.mxu0 %vm910_vm0, %v4638_v44  ;;  %5801 = vmatpush3.bf16.xpose.msk.msra.mxu1 %vm6169_vm1, %v6643_v6  ;;  %v2154_v6 = vld [vmem:[%s6165_s6 + $0xe0] sm:$0xff] }
 0x188   : > { %5804 = vmatprep.subr.msk.bf16.mxu1 %vm6169_vm1, %v6645_v41  ;;  %v5643_v41 = vpack.c.bf16 %v2136_v1, %v2135_v0  ;;  %v5646_v53 = vpack.c.bf16 %v2154_v6, %v2153_v32  ;;  %v4219_v0 = vld [vmem:[%s7353_s23 + $0x8] sm:$0xff]  ;;  %v4221_v1 = vld [vmem:[%s7353_s23 + $0x18] sm:$0xff] }
 0x18a   : > { %5094 = vmatmul.mubr.msk.f32.gmra.mrb[8].mxu0 %vm910_vm0, %v4638_v44 }
 0x18b   : > { %5591 = vmatpush3.bf16.xpose.msk.msra.mxu0 %vm6169_vm1, %v6184_v14  ;;  %5095 = vmatprep.mubr.msk.f32.mxu0 %vm910_vm0, %v4639_v10  ;;  %v2759_v14 = vld [vmem:[%s6165_s6 + $0x119] sm:$0xff] }
 0x18c   : > { %5594 = vmatprep.subr.msk.bf16.mxu0 %vm6169_vm1, %v6186_v15  ;;  %v5814_v58 = vpack.c.bf16 %v2760_v56, %v2759_v14  ;;  %v2999_v14 = vld [vmem:[%s7387_s29] sm:$0xff]  ;;  %v3001_v56 = vld [vmem:[%s7387_s29 + $0x10] sm:$0xff] }
 0x18e   : > { %5096 = vmatmul.mubr.msk.f32.gmra.mrb[10].mxu0 %vm910_vm0, %v4639_v10 }
 0x18f   : > { %5129 = vmatprep.mubr.msk.f32.mxu0 %vm910_vm0, %v4632_v55  ;;  %5807 = vmatpush3.bf16.xpose.msk.msra.mxu1 %vm6169_vm1, %v6657_v7  ;;  %v2156_v7 = vld [vmem:[%s6165_s6 + $0xf0] sm:$0xff] }
 0x190   : > { %5810 = vmatprep.subr.msk.bf16.mxu1 %vm6169_vm1, %v6659_v9  ;;  %v5649_v9 = vpack.c.bf16 %v2138_v3, %v2137_v54  ;;  %v5652_v12 = vpack.c.bf16 %v2156_v7, %v2155_v4 }
 0x193   : > { %5597 = vmatpush3.bf16.xpose.msk.msra.mxu0 %vm6169_vm1, %v6201_v20 }
 0x194   : > { %5600 = vmatprep.subr.msk.bf16.mxu0 %vm6169_vm1, %v6203_v21 }
 0x197   : > { %5813 = vmatpush3.bf16.xpose.msk.msra.mxu1 %vm6169_vm1, %v6669_v17  ;;  %v2140_v17 = vld [vmem:[%s6165_s6 + $0x70] sm:$0xff] }
 0x198   : > { %5816 = vmatprep.subr.msk.bf16.mxu1 %vm6169_vm1, %v5814_v58  ;;  %v5655_v23 = vpack.c.bf16 %v2140_v17, %v2139_v13  ;;  %v3002_v58 = vld [vmem:[%s7387_s29 + $0x18] sm:$0xff] }
 0x19b   : > { %5603 = vmatpush3.bf16.xpose.msk.msra.mxu0 %vm6169_vm1, %v6233_v35 }
 0x19c   : > { %5606 = vmatprep.subr.msk.bf16.mxu0 %vm6169_vm1, %v6240_v38  ;;  %v4833_v38 = vld [vmem:[%s7381_s0 + $0x108] sm:$0xff] }
 0x19f   : > { %5819 = vmatpush3.bf16.xpose.msk.msra.mxu1 %vm6169_vm1, %v6541_v8  ;;  %v2152_v8 = vld [vmem:[%s6165_s6 + $0xd0] sm:$0xff] }
 0x1a3   : > { %5609 = vmatpush3.bf16.xpose.msk.msra.mxu0 %vm6169_vm1, %v6261_v47  ;;  %v4834_v47 = vld [vmem:[%s7381_s0 + $0x110] sm:$0xff] }
 0x1a4   : > { %5612 = vmatprep.subr.msk.bf16.mxu0 %vm6169_vm1, %v6268_v50  ;;  %v4835_v50 = vld [vmem:[%s7381_s0 + $0x118] sm:$0xff] }
 0x1a6   : > { %5290 = vmatmul.mubr.msk.f32.vlgmr.msra.gmra.mrb[8].mxu1 %vm910_vm0, %v4832_v31  ;;  %v4713_v31 = vld [vmem:[%s7381_s0 + $0xe8] sm:$0xff] }
 0x1a7   : > { %5291 = vmatprep.mubr.msk.f32.mxu1 %vm910_vm0, %v4833_v38 }
 0x1aa   : > { %5292 = vmatmul.mubr.msk.f32.gmra.mrb[10].mxu1 %vm910_vm0, %v4833_v38  ;;  %v3211_v38 = vld [vmem:[%s7389_s4] sm:$0xff] }
 0x1ab   : > { %5615 = vmatpush3.bf16.xpose.msk.msra.mxu0 %vm6169_vm1, %v6289_v59  ;;  %5293 = vmatprep.mubr.msk.f32.mxu1 %vm910_vm0, %v4834_v47 }
 0x1ac   : > { %5618 = vmatprep.subr.msk.bf16.mxu0 %vm6169_vm1, %v6296_v62  ;;  %v4633_v62 = vld [vmem:[%s7381_s0 + $0x28] sm:$0xff] }
 0x1ae   : > { %5294 = vmatmul.mubr.msk.f32.gmra.mrb[12].mxu1 %vm910_vm0, %v4834_v47  ;;  %v3212_v47 = vld [vmem:[%s7389_s4 + $0x8] sm:$0xff] }
 0x1af   : > { %5295 = vmatprep.mubr.msk.f32.mxu1 %vm910_vm0, %v4835_v50 }
 0x1b2   : > { %5296 = vmatmul.mubr.msk.f32.gmra.mrb[14].mxu1 %vm910_vm0, %v4835_v50  ;;  %v3313_v50 = vld [vmem:[%s7390_s10] sm:$0xff] }
 0x1b3   : > { %5621 = vmatpush3.bf16.xpose.msk.msra.mxu0 %vm6169_vm1, %v6317_v11 }
 0x1b4   : > { %5624 = vmatprep.subr.msk.bf16.mxu0 %vm6169_vm1, %v6324_v16 }
 0x1b9   : > { %v6956_v59 = vpop.f32.mrb[0].mxu1 }
 0x1ba   : > { %v6961_v11 = vpop.f32.mrb[1].mxu1 }
 0x1bb   : > { %5627 = vmatpush3.bf16.xpose.msk.msra.mxu0 %vm6169_vm1, %v6345_v29  ;;  %v2151_v29 = vld [vmem:[%s6165_s6 + $0xc8] sm:$0xff]  ;;  %s7395_s6 = sshll.u32 %s7397_s5, 4 }
 0x1bc   : > { %5630 = vmatprep.subr.msk.bf16.mxu0 %vm6169_vm1, %v6186_v15  ;;  %v4634_v15 = vld [vmem:[%s7381_s0 + $0x30] sm:$0xff]  ;;  %s865_s12 = scalar_lea.vmem %s7357_s27, %s7395_s6 }
 0x1bd   : > { %v6974_v16 = vpop.f32.mrb[2].mxu1 }
 0x1be   : > { %v6978_v60 = vpop.f32.mrb[3].mxu1 }
 0x1c1   : > { %v6985_v61 = vpop.f32.mrb[4].mxu1 }
 0x1c2   : > { %5130 = vmatmul.mubr.msk.f32.vlgmr.msra.gmra.mrb[4].mxu0 %vm910_vm0, %v4632_v55  ;;  %v6987_v63 = vpop.f32.mrb[5].mxu1 }
 0x1c3   : > { %5633 = vmatpush3.bf16.xpose.msk.msra.mxu0 %vm6169_vm1, %v6201_v20  ;;  %5131 = vmatprep.mubr.msk.f32.mxu0 %vm910_vm0, %v4633_v62  ;;  %v5640_v20 = vpack.c.bf16 %v2152_v8, %v2151_v29  ;;  %v3875_v29 = vld [vmem:[%s7350_s20] sm:$0xff]  ;;  %v3876_v8 = vld [vmem:[%s7350_s20 + $0x8] sm:$0xff] }
 0x1c4   : > { %5636 = vmatprep.subr.msk.bf16.mxu0 %vm6169_vm1, %v6203_v21  ;;  %v4635_v21 = vld [vmem:[%s7381_s0 + $0x38] sm:$0xff]  ;;  %s7391_s0 = sld [smem:[#allocation3_spill]] }
 0x1c5   : > { %v7001_v27 = vpop.f32.mrb[6].mxu1 }
 0x1c6   : > { %5132 = vmatmul.mubr.msk.f32.gmra.mrb[6].mxu0 %vm910_vm0, %v4633_v62  ;;  %v3314_v62 = vld [vmem:[%s7390_s10 + $0x8] sm:$0xff] }
 0x1c7   : > { %5133 = vmatprep.mubr.msk.f32.mxu0 %vm910_vm0, %v4634_v15 }
 0x1ca   : > { %5134 = vmatmul.mubr.msk.f32.gmra.mrb[8].mxu0 %vm910_vm0, %v4634_v15  ;;  %v3584_v15 = vld [vmem:[%s7348_s18 + $0x8] sm:$0xff]  ;;  %v1755_v36 = vld [vmem:[%s7391_s0] sm:$0x3] }
 0x1cb   : > { %5639 = vmatpush3.bf16.xpose.msk.msra.mxu0 %vm6169_vm1, %v6233_v35  ;;  %5135 = vmatprep.mubr.msk.f32.mxu0 %vm910_vm0, %v4635_v21  ;;  %v7005_v35 = vpop.f32.mrb[7].mxu1 }
 0x1cc   : > { %5642 = vmatprep.subr.msk.bf16.mxu0 %vm6169_vm1, %v5640_v20  ;;  %v3877_v20 = vld [vmem:[%s7350_s20 + $0x10] sm:$0xff] }
 0x1ce   : > { %5136 = vmatmul.mubr.msk.f32.gmra.mrb[10].mxu0 %vm910_vm0, %v4635_v21  ;;  %v3878_v21 = vld [vmem:[%s7350_s20 + $0x18] sm:$0xff] }
 0x1cf   : > { %5169 = vmatprep.mubr.msk.f32.mxu0 %vm910_vm0, %v4712_v2 }
 0x1d3   : > { %5645 = vmatpush3.bf16.xpose.msk.msra.mxu0 %vm6169_vm1, %v5643_v41 }
 0x1d4   : > { %5648 = vmatprep.subr.msk.bf16.mxu0 %vm6169_vm1, %v5646_v53 }
 0x1db   : > { %5651 = vmatpush3.bf16.xpose.msk.msra.mxu0 %vm6169_vm1, %v5649_v9 }
 0x1dc   : > { %5654 = vmatprep.subr.msk.bf16.mxu0 %vm6169_vm1, %v5652_v12 }
 0x1e3   : > { %5657 = vmatpush3.bf16.xpose.msk.msra.mxu0 %vm6169_vm1, %v5655_v23 }
 0x1e4   : > { %5660 = vmatprep.subr.msk.bf16.mxu0 %vm6169_vm1, %v5658_v24  ;;  %v1757_v24 = vlaneseq }
 0x1e6   : > { %v1758_v25 = vshrl.u32 %v1757_v24, 7 }
 0x1e8   : > { %v1759_v34 = vsub.s32 0, %v1758_v25 }
 0x1ea   : > { %v1760_v43 = vrot.slane %v1755_v36, %v1759_v34 }
 0x1eb   : > { %5663 = vmatpush3.bf16.xpose.msk.msra.mxu0 %vm6169_vm1, %v5661_v37  ;;  %v1763_v37 = vsub.s32 1, %v1758_v25 }
 0x1ec   : > { %5666 = vmatprep.subr.msk.bf16.mxu0 %vm6169_vm1, %v5664_v39  ;;  %v4218_v39 = vld [vmem:[%s7353_s23] sm:$0xff]  ;;  %v1767_v52 = vmul.f32 %v1760_v43, %v6956_v59 }
 0x1ed   : > { %v1764_v48 = vrot.slane %v1755_v36, %v1763_v37 }
 0x1ef   : > { %v1768_v19 = vmul.f32 %v1764_v48, %v6961_v11  ;;  %v1770_v59 = vmul.f32 %v1764_v48, %v6978_v60 }
 0x1f3   : > { %5669 = vmatpush3.bf16.xpose.msk.msra.mxu0 %vm6169_vm1, %v5667_v51  ;;  %v2976_v51 = vrot.slane %v2971_v40, %v1759_v34 }
 0x1f4   : > { %5672 = vmatprep.subr.msk.bf16.mxu0 %vm6169_vm1, %v5670_v18  ;;  %v2980_v18 = vrot.slane %v2971_v40, %v1763_v37 }
 0x1fb   : > { %5675 = vmatpush3.bf16.xpose.msk.msra.mxu0 %vm6169_vm1, %v5673_v30 }
 0x202   : > { %5170 = vmatmul.mubr.msk.f32.vlgmr.msra.gmra.mrb[4].mxu0 %vm910_vm0, %v4712_v2 }
 0x203   : > { %5171 = vmatprep.mubr.msk.f32.mxu0 %vm910_vm0, %v4713_v31 }
 0x206   : > { %5172 = vmatmul.mubr.msk.f32.gmra.mrb[6].mxu0 %vm910_vm0, %v4713_v31  ;;  %v4259_v31 = vld [vmem:[%s7355_s25] sm:$0xff] }
 0x207   : > { %5173 = vmatprep.mubr.msk.f32.mxu0 %vm910_vm0, %v4714_v33 }
 0x20a   : > { %5174 = vmatmul.mubr.msk.f32.gmra.mrb[8].mxu0 %vm910_vm0, %v4714_v33 }
 0x20b   : > { %5175 = vmatprep.mubr.msk.f32.mxu0 %vm910_vm0, %v4715_v5 }
 0x20e   : > { %5176 = vmatmul.mubr.msk.f32.gmra.mrb[10].mxu0 %vm910_vm0, %v4715_v5 }
 0x210   : > { %v1159_v46 = vpop.f32.mrb[2].mxu0 }
 0x211   : > { %v1160_v57 = vadd.f32 %v1159_v46, %v1088_v45  ;;  %v1161_v44 = vpop.f32.mrb[3].mxu0 }
 0x212   : > { %v1162_v10 = vadd.f32 %v1161_v44, %v1088_v45  ;;  %v1769_v44 = vmul.f32 %v1760_v43, %v6974_v16 }
 0x213   : > { %1164 = vst [vmem:[%s860_s9] sm:$0xff] %v1160_v57 }
 0x214   : > { %v3039_v55 = vmax.f32 %v1160_v57, %v1162_v10  ;;  %1165 = vst [vmem:[%s860_s9 + $0x8] sm:$0xff] %v1162_v10 }
 0x216   : > { %3040 = vmax.xlane.f32.xlu1 %v3039_v55 }
 0x227   : > { %3005 = vperm.xlu1 %5959, %v2999_v14  }
 0x22b   : > { %3015 = vperm.xlu1 %5959, %v3001_v56  }
 0x22f   : > { %3020 = vperm.xlu1 %5959, %v3002_v58  }
 0x233   : > { %3215 = vperm.xlu1 %5959, %v3211_v38  }
 0x237   : > { %3220 = vperm.xlu1 %5959, %v3212_v47  }
 0x23b   : > { %3317 = vperm.xlu1 %5959, %v3313_v50  }
 0x23f   : > { %3322 = vperm.xlu1 %5959, %v3314_v62   ;;  %v3011_v62 = vpop.permute.xlu0 %3010 }
 0x243   : > { %3592 = vperm.xlu1 %5959, %v3584_v15   ;;  %v1771_v15 = vmul.f32 %v1760_v43, %v6985_v61 }
 0x247   : > { %3881 = vperm.xlu1 %5959, %v3875_v29  }
 0x24b   : > { %3886 = vperm.xlu1 %5959, %v3876_v8  }
 0x24f   : > { %3891 = vperm.xlu1 %5959, %v3877_v20   ;;  %v1772_v20 = vmul.f32 %v1764_v48, %v6987_v63 }
 0x253   : > { %3896 = vperm.xlu1 %5959, %v3878_v21  }
 0x257   : > { %4229 = vperm.xlu1 %5959, %v4219_v0  }
 0x25b   : > { %4239 = vperm.xlu1 %5959, %v4221_v1  }
 0x279   : > { %v2940_v2 = vpop.f32.mrb[8].mxu1 }
 0x27a   : > { %v2942_v32 = vpop.f32.mrb[9].mxu1  ;;  %v2983_v33 = vmul.f32 %v2976_v51, %v2940_v2 }
 0x27b   : > { %v2984_v46 = vmul.f32 %v2980_v18, %v2942_v32 }
 0x27d   : > { %v2946_v6 = vpop.f32.mrb[10].mxu1 }
 0x27e   : > { %v2948_v41 = vpop.f32.mrb[11].mxu1  ;;  %v2985_v55 = vmul.f32 %v2976_v51, %v2946_v6 }
 0x27f   : > { %v2986_v58 = vmul.f32 %v2980_v18, %v2948_v41  ;;  %v1773_v41 = vmul.f32 %v1760_v43, %v7001_v27 }
 0x281   : > { %v2952_v53 = vpop.f32.mrb[12].mxu1 }
 0x282   : > { %v2954_v54 = vpop.f32.mrb[13].mxu1  ;;  %v2987_v8 = vmul.f32 %v2976_v51, %v2952_v53 }
 0x283   : > { %v2988_v1 = vmul.f32 %v2980_v18, %v2954_v54 }
 0x285   : > { %v7113_v3 = vpop.f32.mrb[14].mxu1 }
 0x286   : > { %v7115_v4 = vpop.f32.mrb[15].mxu1  ;;  %v2989_v53 = vmul.f32 %v2976_v51, %v7113_v3 }
 0x287   : > { %v2990_v54 = vmul.f32 %v2980_v18, %v7115_v4 }
 0x2a3   : > { %v3041_v7 = vpop.xlane.xlu1 %3040 }
 0x2a4   : > { %v3042_v9 = vsub.f32 %v1160_v57, %v3041_v7  ;;  %v3043_v12 = vsub.f32 %v1162_v10, %v3041_v7 }
 0x2a6   : > { %v3044_v13 = vmul.f32 1.442695, %v3042_v9  ;;  %v3046_v17 = vmul.f32 1.442695, %v3043_v12 }
 0x2a7   : > { %v3006_v11 = vpop.permute.xlu1 %3005 }
 0x2a8   : > { %5960 = vpow2.f32 %v3044_v13  ;;  %v1774_v13 = vmul.f32 %v1764_v48, %v7005_v35 }
 0x2a9   : > { %5962 = vpow2.f32 %v3046_v17 }
 0x2ab   : > { %v3016_v2 = vpop.permute.xlu1 %3015 }
 0x2af   : > { %v3021_v27 = vpop.permute.xlu1 %3020 }
 0x2b2   : > { %v7117_v22 = vpop.eup %5960 }
 0x2b3   : > { %v7119_v26 = vpop.eup %5962 }
 0x2b4   : > { %v3048_v23 = vadd.f32 %v7119_v26, %v7117_v22 }
 0x2b6   : > { %3049 = vadd.xlane.f32.xlu0 %v3048_v23 }
 0x2cc   : > { %3587 = vperm.xlu0 %5958, %v3583_v28  }
 0x2d0   : > { %4224 = vperm.xlu0 %5958, %v4218_v39  }
 0x2d4   : > { %4234 = vperm.xlu0 %5958, %v4220_v49  }
 0x2d5   : > { %v2342_v30 = vpop.f32.mrb[4].mxu0 }
 0x2d6   : > { %v2373_v5 = vadd.f32 %v2342_v30, %v1767_v52  ;;  %v2344_v45 = vpop.f32.mrb[5].mxu0 }
 0x2d7   : > { %v2374_v57 = vadd.f32 %v2344_v45, %v1768_v19 }
 0x2d8   : > { %v2991_v10 = vadd.f32 %v2983_v33, %v2373_v5  ;;  %4262 = vperm.xlu0 %5958, %v4259_v31  }
 0x2d9   : > { %v2992_v14 = vadd.f32 %v2984_v46, %v2374_v57  ;;  %v2348_v56 = vpop.f32.mrb[6].mxu0 }
 0x2da   : > { %v2375_v38 = vadd.f32 %v2348_v56, %v1769_v44  ;;  %v2350_v47 = vpop.f32.mrb[7].mxu0  ;;  %v3023_v32 = vadd.f32 %v3006_v11, %v2991_v10 }
 0x2db   : > { %v2376_v50 = vadd.f32 %v2350_v47, %v1770_v59  ;;  %v3024_v16 = vadd.f32 %v3006_v11, %v2992_v14 }
 0x2dc   : > { %v2993_v29 = vadd.f32 %v2985_v55, %v2375_v38  ;;  %v3031_v28 = vmax.f32 %v3023_v32, 0.0 }
 0x2dd   : > { %v2994_v21 = vadd.f32 %v2986_v58, %v2376_v50  ;;  %v2354_v0 = vpop.f32.mrb[8].mxu0  ;;  %v3032_v63 = vmax.f32 %v3024_v16, 0.0 }
 0x2de   : > { %v3025_v60 = vadd.f32 %v3011_v62, %v2993_v29  ;;  %v2377_v6 = vadd.f32 %v2354_v0, %v1771_v15  ;;  %v2356_v7 = vpop.f32.mrb[9].mxu0 }
 0x2df   : > { %v3026_v9 = vadd.f32 %v3011_v62, %v2994_v21  ;;  %v2378_v12 = vadd.f32 %v2356_v7, %v1772_v20  ;;  %v3216_v62 = vpop.permute.xlu1 %3215 }
 0x2e0   : > { %v3033_v61 = vmax.f32 %v3025_v60, 0.0  ;;  %v2995_v17 = vadd.f32 %v2987_v8, %v2377_v6 }
 0x2e1   : > { %v3034_v23 = vmax.f32 %v3026_v9, 0.0  ;;  %v2996_v24 = vadd.f32 %v2988_v1, %v2378_v12  ;;  %v2360_v25 = vpop.f32.mrb[10].mxu0  ;;  %v3413_v12 = vld [vmem:[%s7343_s13] sm:$0xff] }
 0x2e2   : > { %v2379_v34 = vadd.f32 %v2360_v25, %v1773_v41  ;;  %v2362_v36 = vpop.f32.mrb[11].mxu0  ;;  %v7153_v40 = vpack.c.bf16 %v3033_v61, %v3031_v28  ;;  %v3027_v3 = vadd.f32 %v3016_v2, %v2995_v17 }
 0x2e3   : > { %v2380_v37 = vadd.f32 %v2362_v36, %v1774_v13  ;;  %v7151_v39 = vpack.c.bf16 %v3034_v23, %v3032_v63  ;;  %v3028_v43 = vadd.f32 %v3016_v2, %v2996_v24  ;;  %v3221_v20 = vpop.permute.xlu1 %3220  ;;  %v3414_v13 = vld [vmem:[%s7343_s13 + $0x8] sm:$0xff] }
 0x2e4   : > { %v2997_v35 = vadd.f32 %v2989_v53, %v2379_v34  ;;  %v3035_v19 = vmax.f32 %v3027_v3, 0.0  ;;  %v5841_v17 = vpack.c.bf16 %v3414_v13, %v3413_v12  ;;  %v5984_v53 = vmov 0.0|0.0   ;;  %v3312_v24 = vld [vmem:[%s7394_s11 + $0x8] sm:$0xff] }
 0x2e5   : > { %v2998_v48 = vadd.f32 %v2990_v54, %v2380_v37  ;;  %5821 = vmatprep.subr.bf16.mxu0 %v7151_v39  ;;  %v3036_v18 = vmax.f32 %v3028_v43, 0.0  ;;  %v3498_v54 = vld [vmem:[%s7345_s15] sm:$0xff] }
 0x2e6   : > { %v3029_v49 = vadd.f32 %v3021_v27, %v2997_v35  ;;  %5823 = vmatpush1.bf16.xpose.msra.mxu0 %v7153_v40 }
 0x2e7   : > { %v3030_v51 = vadd.f32 %v3021_v27, %v2998_v48  ;;  %v3318_v36 = vpop.permute.xlu1 %3317 }
 0x2e8   : > { %v3037_v4 = vmax.f32 %v3029_v49, 0.0 }
 0x2e9   : > { %v3038_v52 = vmax.f32 %v3030_v51, 0.0 }
 0x2ea   : > { %v7159_v31 = vpack.c.bf16 %v3037_v4, %v3035_v19 }
 0x2eb   : > { %v7157_v30 = vpack.c.bf16 %v3038_v52, %v3036_v18  ;;  %v3323_v43 = vpop.permute.xlu1 %3322 }
 0x2ed   : > { %5825 = vmatprep.subr.bf16.mxu0 %v7157_v30 }
 0x2ee   : > { %5827 = vmatpush1.bf16.xpose.msra.mxu0 %v7159_v31 }
 0x343   : > { %v3050_v33 = vpop.xlane.xlu0 %3049 }
 0x344   : > { %5964 = vrcp.f32 %v3050_v33 }
 0x34e   : > { %v5965_v5 = vpop.eup %5964 }
 0x34f   : > { %v3052_v45 = vmul.f32 %v5965_v5, %v7117_v22  ;;  %v3053_v46 = vmul.f32 %v5965_v5, %v7119_v26  ;;  %v3209_v22 = vld [vmem:[%s7393_s2] sm:$0xff]  ;;  %v3210_v26 = vld [vmem:[%s7393_s2 + $0x8] sm:$0xff] }
 0x351   : > { %3118 = vmatprep.mubr.f32.mxu0 %v3053_v46  ;;  %3124 = vmatprep.subr.mxu0 %v3053_v46 }
 0x352   : > { %3119 = vmatmul.mubr.f32.vlgmr.msra.gmra.mrb[12].mxu0 %v3052_v45 }
 0x353   : > { %3125 = vmatpush1.xpose.msra.mxu0 %v3052_v45  ;;  %3188 = vmatprep.mubr.f32.mxu0 %v3032_v63  ;;  %v3415_v63 = vld [vmem:[%s7343_s13 + $0x10] sm:$0xff] }
 0x354   : > { %5829 = vmatprep.subr.bf16.mxu0 %v7151_v39 }
 0x356   : > { %3189 = vmatmul.mubr.f32.vlgmr.msra.gmra.mrb[14].mxu0 %v3031_v28  ;;  %v3499_v28 = vld [vmem:[%s7345_s15 + $0x8] sm:$0xff] }
 0x357   : > { %5831 = vmatpush1.bf16.msra.mxu0 %v7153_v40  ;;  %3193 = vmatprep.mubr.f32.mxu0 %v3034_v23  ;;  %v3416_v23 = vld [vmem:[%s7343_s13 + $0x18] sm:$0xff]  ;;  %v5847_v34 = vpack.c.bf16 %v3499_v28, %v3498_v54 }
 0x358   : > { %5833 = vmatprep.subr.bf16.mxu0 %v7157_v30  ;;  %v5844_v25 = vpack.c.bf16 %v3416_v23, %v3415_v63 }
 0x35a   : > { %3194 = vmatmul.mubr.f32.gmra.mrb[16].mxu0 %v3033_v61  ;;  %v3311_v61 = vld [vmem:[%s7394_s11] sm:$0xff] }
 0x35b   : > { %5835 = vmatpush1.bf16.msra.mxu0 %v7159_v31  ;;  %3198 = vmatprep.mubr.f32.mxu0 %v3036_v18  ;;  %v4876_v18 = vld [vmem:[%s7344_s14] ss:$0 sm:$0xff] }
 0x35e   : > { %3199 = vmatmul.mubr.f32.gmra.mrb[18].mxu0 %v3035_v19 }
 0x35f   : > { %3203 = vmatprep.mubr.f32.mxu0 %v3038_v52 }
 0x362   : > { %3204 = vmatmul.mubr.f32.gmra.mrb[20].mxu0 %v3037_v4 }
 0x363   : > { %3294 = vmatprep.mubr.f32.mxu0 %v5983_v42 }
 0x366   : > { %4872 = vmatmul.mubr.msk.f32.vlgmr.msra.gmra.mrb[22].mxu0 %vm3223_vm2, %v3209_v22 }
 0x367   : > { %3300 = vmatprep.mubr.f32.mxu0 %v5983_v42 }
 0x36a   : > { %4873 = vmatmul.mubr.msk.f32.gmra.mrb[24].mxu0 %vm3223_vm2, %v3210_v26 }
 0x36b   : > { %3396 = vmatprep.mubr.f32.mxu0 %v5983_v42 }
 0x425   : > { %v3120_v57 = vpop.f32.mrb[12].mxu0 }
 0x426   : > { %v3122_v44 = vpop.f32.mrb[13].mxu0 }
 0x429   : > { %v3190_v10 = vpop.f32.mrb[14].mxu0 }
 0x42a   : > { %v3192_v55 = vpop.f32.mrb[15].mxu0 }
 0x42b   : > { %v3582_v55 = vld [vmem:[%s7347_s17 + $0x8] sm:$0xff] }
 0x42d   : > { %v3195_v59 = vpop.f32.mrb[16].mxu0 }
 0x42e   : > { %v7180_v14 = vpack.c.bf16 %v3195_v59, %v3190_v10  ;;  %v3197_v56 = vpop.f32.mrb[17].mxu0  ;;  %v3581_v10 = vld [vmem:[%s7347_s17] sm:$0xff] }
 0x42f   : > { %v4878_v59 = vld [vmem:[%s7346_s16] ss:$0 sm:$0xff] }
 0x431   : > { %v3200_v11 = vpop.f32.mrb[18].mxu0 }
 0x432   : > { %v3202_v58 = vpop.f32.mrb[19].mxu0 }
 0x435   : > { %v3205_v38 = vpop.f32.mrb[20].mxu0 }
 0x436   : > { %v7182_v47 = vpack.c.bf16 %v3205_v38, %v3200_v11  ;;  %v3207_v50 = vpop.f32.mrb[21].mxu0 }
 0x439   : > { %v3296_v15 = vpop.f32.mrb[22].mxu0 }
 0x43a   : > { %v3298_v29 = vpop.f32.mrb[23].mxu0  ;;  %v3297_v8 = vadd.f32 %v3296_v15, %v3216_v62 }
 0x43b   : > { %v3299_v16 = vadd.f32 %v3298_v29, %v3216_v62 }
 0x43c   : > { %v3307_v60 = vmax.f32 %v3297_v8, 0.0 }
 0x43d   : > { %v3302_v21 = vpop.f32.mrb[24].mxu0  ;;  %v3308_v6 = vmax.f32 %v3299_v16, 0.0 }
 0x43e   : > { %v3303_v0 = vadd.f32 %v3302_v21, %v3221_v20  ;;  %v3304_v1 = vpop.f32.mrb[25].mxu0 }
 0x43f   : > { %v3305_v2 = vadd.f32 %v3304_v1, %v3221_v20 }
 0x440   : > { %v3309_v32 = vmax.f32 %v3303_v0, 0.0 }
 0x441   : > { %v3310_v7 = vmax.f32 %v3305_v2, 0.0 }
 0x442   : > { %v5838_v41 = vpack.c.bf16 %v3309_v32, %v3307_v60 }
 0x443   : > { %v5836_v9 = vpack.c.bf16 %v3310_v7, %v3308_v6 }
 0x445   : > { %5837 = vmatprep.subr.bf16.mxu0 %v5836_v9 }
 0x446   : > { %5839 = vmatpush1.bf16.msra.mxu0 %v5838_v41 }
 0x447   : > { %5840 = vmatprep.subr.bf16.mxu0 %v5984_v53 }
 0x449   : > { %4874 = vmatmul.mubr.msk.f32.vlgmr.msra.gmra.mrb[26].mxu0 %vm3325_vm3, %v3311_v61 }
 0x44a   : > { %5842 = vmatpush3.bf16.msra.mxu0 %v5841_v17  ;;  %3402 = vmatprep.mubr.f32.mxu0 %v5983_v42 }
 0x44b   : > { %5843 = vmatprep.subr.bf16.mxu0 %v5984_v53 }
 0x44d   : > { %4875 = vmatmul.mubr.msk.f32.gmra.mrb[28].mxu0 %vm3325_vm3, %v3312_v24 }
 0x44e   : > { %5845 = vmatpush3.bf16.msra.mxu0 %v5844_v25  ;;  %5319 = vmatprep.mubr.msk.f32.mxu0 %vm5985_vm4, %v5983_v42 }
 0x44f   : > { %5846 = vmatprep.subr.bf16.mxu0 %v5984_v53 }
 0x451   : > { %5320 = vmatmul.mubr.msk.f32.vlgmr.msra.gmra.mrb[30].mxu0 %vm3223_vm2, %v3120_v57 }
 0x452   : > { %5848 = vmatpush3.bf16.msra.mxu0 %v5847_v34  ;;  %5326 = vmatprep.mubr.msk.f32.mxu0 %vm5985_vm4, %v5983_v42 }
 0x453   : > { %5850 = vmatprep.subr.bf16.mxu0 %v7180_v14 }
 0x51c   : > { %v3398_v37 = vpop.f32.mrb[26].mxu0 }
 0x51d   : > { %v3400_v27 = vpop.f32.mrb[27].mxu0  ;;  %v3399_v35 = vadd.f32 %v3398_v37, %v3318_v36 }
 0x51e   : > { %v3401_v48 = vadd.f32 %v3400_v27, %v3318_v36 }
 0x51f   : > { %v3409_v52 = vmax.f32 %v3399_v35, 0.0 }
 0x520   : > { %v3404_v3 = vpop.f32.mrb[28].mxu0  ;;  %v3410_v33 = vmax.f32 %v3401_v48, 0.0  ;;  %v3588_v48 = vpop.permute.xlu0 %3587 }
 0x521   : > { %v3405_v49 = vadd.f32 %v3404_v3, %v3323_v43  ;;  %v3406_v51 = vpop.f32.mrb[29].mxu0 }
 0x522   : > { %v3407_v4 = vadd.f32 %v3406_v51, %v3323_v43 }
 0x523   : > { %v3411_v19 = vmax.f32 %v3405_v49, 0.0 }
 0x524   : > { %v3412_v5 = vmax.f32 %v3407_v4, 0.0  ;;  %v3493_v45 = vpop.f32.mrb[30].mxu0 }
 0x525   : > { %v5859_v46 = vpack.c.bf16 %v3411_v19, %v3409_v52  ;;  %v3494_v22 = vadd.f32 %v4876_v18, %v3493_v45  ;;  %v5321_v26 = vpop.f32.mrb[31].mxu0  ;;  %v3593_v18 = vpop.permute.xlu1 %3592 }
 0x526   : > { %v5857_v57 = vpack.c.bf16 %v3412_v5, %v3410_v33 }
 0x527   : > { %v3497_v44 = vmax.f32 %v3494_v22, 0.0 }
 0x529   : > { %5327 = vmatmul.mubr.msk.f32.vlgmr.msra.gmra.mrb[32].mxu0 %vm3325_vm3, %v3497_v44 }
 0x52a   : > { %5852 = vmatpush3.bf16.msra.mxu0 %v7180_v14  ;;  %5337 = vmatprep.mubr.msk.f32.mxu0 %vm3223_vm2, %v3581_v10  ;;  %v3871_v10 = vld [vmem:[%s7349_s19] sm:$0xff] }
 0x52b   : > { %5854 = vmatprep.subr.bf16.mxu0 %v7182_v47 }
 0x52e   : > { %5856 = vmatpush3.bf16.msra.mxu0 %v7182_v47 }
 0x52f   : > { %5858 = vmatprep.subr.bf16.mxu0 %v5857_v57 }
 0x531   : > { %5338 = vmatmul.mubr.msk.f32.vlgmr.msra.gmra.mrb[34].mxu0 %vm3223_vm2, %v3582_v55  ;;  %v3872_v55 = vld [vmem:[%s7349_s19 + $0x8] sm:$0xff] }
 0x532   : > { %5860 = vmatpush1.bf16.msra.mxu0 %v5859_v46  ;;  %3745 = vmatprep.mubr.f32.mxu0 %v5983_v42 }
 0x5fc   : > { %v3576_v14 = vpop.f32.mrb[32].mxu0 }
 0x5fd   : > { %v3577_v56 = vadd.f32 %v4878_v59, %v3576_v14  ;;  %v5328_v11 = vpop.f32.mrb[33].mxu0  ;;  %v4014_v59 = vld [vmem:[%s7352_s22 + $0x10] sm:$0xff]  ;;  %v4015_v14 = vld [vmem:[%s7352_s22 + $0x18] sm:$0xff] }
 0x5ff   : > { %v3580_v58 = vmax.f32 %v3577_v56, 0.0  ;;  %v3882_v56 = vpop.permute.xlu1 %3881 }
 0x601   : > { %4882 = vmatmul.mubr.msk.f32.vlgmr.msra.gmra.mrb[36].mxu0 %vm3325_vm3, %v3580_v58 }
 0x602   : > { %3858 = vmatprep.mubr.f32.mxu0 %v5983_v42 }
 0x603   : > { %v3887_v11 = vpop.permute.xlu1 %3886 }
 0x604   : > { %v5339_v38 = vpop.f32.mrb[34].mxu0 }
 0x605   : > { %v3667_v47 = vpop.f32.mrb[35].mxu0  ;;  %v3673_v19 = vadd.f32 %v5339_v38, %v3593_v18 }
 0x606   : > { %v3668_v49 = vadd.f32 %v3667_v47, %v3588_v48 }
 0x607   : > { %v3677_v5 = vmax.f32 %v3673_v19, 0.0 }
 0x608   : > { %v3676_v33 = vmax.f32 %v3668_v49, 0.0 }
 0x6d4   : > { %v3747_v50 = vpop.f32.mrb[36].mxu0 }
 0x6d5   : > { %v3752_v62 = vmul.f32 0.25, %v3747_v50  ;;  %v3749_v15 = vpop.f32.mrb[37].mxu0 }
 0x6d6   : > { %v3753_v29 = vmul.f32 0.25, %v3749_v15 }
 0x6d7   : > { %v3754_v8 = vrot.slane %v3752_v62, 4 }
 0x6d8   : > { %v3760_v20 = vrot.slane %v3753_v29, 4 }
 0x6d9   : > { %v3755_v16 = vmax.f32 %v3752_v62, %v3754_v8  ;;  %v3892_v8 = vpop.permute.xlu1 %3891 }
 0x6da   : > { %v3761_v21 = vmax.f32 %v3753_v29, %v3760_v20 }
 0x6db   : > { %v3756_v0 = vrot.slane %v3755_v16, 2 }
 0x6dc   : > { %v3762_v1 = vrot.slane %v3761_v21, 2 }
 0x6dd   : > { %v3757_v2 = vmax.f32 %v3755_v16, %v3756_v0 }
 0x6de   : > { %v3763_v60 = vmax.f32 %v3761_v21, %v3762_v1 }
 0x6df   : > { %v3758_v32 = vrot.slane %v3757_v2, 1 }
 0x6e0   : > { %v3764_v6 = vrot.slane %v3763_v60, 1 }
 0x6e1   : > { %v3759_v7 = vmax.f32 %v3757_v2, %v3758_v32 }
 0x6e2   : > { %v3765_v41 = vmax.f32 %v3763_v60, %v3764_v6 }
 0x6e3   : > { %v3766_v9 = vsub.f32 %v3752_v62, %v3759_v7 }
 0x6e4   : > { %v3767_v12 = vsub.f32 %v3753_v29, %v3765_v41  ;;  %v3897_v41 = vpop.permute.xlu1 %3896 }
 0x6e5   : > { %v3768_v13 = vmul.f32 1.442695, %v3766_v9 }
 0x6e6   : > { %v3770_v61 = vmul.f32 1.442695, %v3767_v12 }
 0x6e7   : > { %5966 = vpow2.f32 %v3768_v13 }
 0x6e8   : > { %5968 = vpow2.f32 %v3770_v61 }
 0x6f1   : > { %v5967_v17 = vpop.eup %5966 }
 0x6f2   : > { %v5969_v53 = vpop.eup %5968  ;;  %v3772_v63 = vrot.slane %v5967_v17, 4 }
 0x6f3   : > { %v3778_v23 = vrot.slane %v5969_v53, 4 }
 0x6f4   : > { %v3773_v24 = vadd.f32 %v5967_v17, %v3772_v63 }
 0x6f5   : > { %v3779_v25 = vadd.f32 %v5969_v53, %v3778_v23 }
 0x6f6   : > { %v3774_v54 = vrot.slane %v3773_v24, 2 }
 0x6f7   : > { %v3780_v28 = vrot.slane %v3779_v25, 2 }
 0x6f8   : > { %v3775_v34 = vadd.f32 %v3774_v54, %v3773_v24 }
 0x6f9   : > { %v3781_v36 = vadd.f32 %v3780_v28, %v3779_v25  ;;  %v4008_v28 = vld [vmem:[%s7351_s21] sm:$0xff] }
 0x6fa   : > { %v3776_v37 = vrot.slane %v3775_v34, 1 }
 0x6fb   : > { %v3782_v27 = vrot.slane %v3781_v36, 1 }
 0x6fc   : > { %v3777_v35 = vadd.f32 %v3776_v37, %v3775_v34  ;;  %v4009_v34 = vld [vmem:[%s7351_s21 + $0x8] sm:$0xff]  ;;  %v4011_v37 = vld [vmem:[%s7351_s21 + $0x18] sm:$0xff] }
 0x6fd   : > { %v3783_v43 = vadd.f32 %v3782_v27, %v3781_v36  ;;  %v4010_v36 = vld [vmem:[%s7351_s21 + $0x10] sm:$0xff]  ;;  %v4225_v27 = vpop.permute.xlu0 %4224 }
 0x6fe   : > { %5970 = vrcp.f32 %v3777_v35 }
 0x6ff   : > { %5972 = vrcp.f32 %v3783_v43 }
 0x708   : > { %v5971_v3 = vpop.eup %5970 }
 0x709   : > { %v5973_v51 = vpop.eup %5972  ;;  %v3786_v52 = vmul.f32 %v5971_v3, %v5967_v17 }
 0x70a   : > { %v3787_v4 = vmul.f32 %v5973_v51, %v5969_v53  ;;  %v4230_v51 = vpop.permute.xlu1 %4229 }
 0x70c   : > { %3794 = vmatprep.subr.mxu0 %v3787_v4 }
 0x70d   : > { %3795 = vmatpush1.msra.mxu0 %v3786_v52 }
 0x70e   : > { %4883 = vmatmul.mubr.msk.f32.vlgmr.msra.gmra.mrb[38].mxu0 %vm910_vm0, %v3676_v33 }
 0x70f   : > { %3864 = vmatprep.mubr.f32.mxu0 %v5983_v42 }
 0x712   : > { %4884 = vmatmul.mubr.msk.f32.gmra.mrb[40].mxu0 %vm910_vm0, %v3677_v5  ;;  %v4235_v5 = vpop.permute.xlu0 %4234 }
 0x713   : > { %3975 = vmatprep.mubr.f32.mxu0 %v5983_v42 }
 0x7e1   : > { %v3860_v45 = vpop.f32.mrb[38].mxu0 }
 0x7e2   : > { %v3862_v46 = vpop.f32.mrb[39].mxu0 }
 0x7e5   : > { %v3866_v22 = vpop.f32.mrb[40].mxu0 }
 0x7e6   : > { %v5863_v26 = vpack.c.bf16 %v3866_v22, %v3860_v45  ;;  %v3868_v57 = vpop.f32.mrb[41].mxu0 }
 0x7e7   : > { %v5861_v44 = vpack.c.bf16 %v3868_v57, %v3862_v46 }
 0x7e9   : > { %5862 = vmatprep.subr.bf16.mxu0 %v5861_v44 }
 0x7ea   : > { %5864 = vmatpush1.bf16.msra.mxu0 %v5863_v26 }
 0x7eb   : > { %5866 = vmatprep.subr.bf16.mxu0 %v7151_v39  ;;  %v3873_v39 = vld [vmem:[%s7349_s19 + $0x10] sm:$0xff] }
 0x7ed   : > { %4885 = vmatmul.mubr.msk.f32.vlgmr.msra.gmra.mrb[42].mxu0 %vm3325_vm3, %v3871_v10 }
 0x7ee   : > { %5868 = vmatpush1.bf16.msra.mxu0 %v7153_v40  ;;  %3981 = vmatprep.mubr.f32.mxu0 %v5983_v42  ;;  %v3874_v40 = vld [vmem:[%s7349_s19 + $0x18] sm:$0xff] }
 0x7ef   : > { %5870 = vmatprep.subr.bf16.mxu0 %v7157_v30  ;;  %v4012_v30 = vld [vmem:[%s7352_s22] sm:$0xff] }
 0x7f1   : > { %4886 = vmatmul.mubr.msk.f32.gmra.mrb[44].mxu0 %vm3325_vm3, %v3872_v55 }
 0x7f2   : > { %5872 = vmatpush1.bf16.msra.mxu0 %v7159_v31  ;;  %3987 = vmatprep.mubr.f32.mxu0 %v5983_v42  ;;  %v4013_v31 = vld [vmem:[%s7352_s22 + $0x8] sm:$0xff] }
 0x7f5   : > { %4887 = vmatmul.mubr.msk.f32.gmra.mrb[46].mxu0 %vm3325_vm3, %v3873_v39  ;;  %v4240_v39 = vpop.permute.xlu1 %4239 }
 0x7f6   : > { %3993 = vmatprep.mubr.f32.mxu0 %v5983_v42 }
 0x7f9   : > { %4888 = vmatmul.mubr.msk.f32.gmra.mrb[48].mxu0 %vm3325_vm3, %v3874_v40 }
 0x7fa   : > { %4092 = vmatprep.mubr.f32.mxu0 %v5983_v42 }
 0x7fd   : > { %4889 = vmatmul.mubr.msk.f32.vlgmr.msra.gmra.mrb[50].mxu0 %vm3223_vm2, %v4012_v30 }
 0x7fe   : > { %4098 = vmatprep.mubr.f32.mxu0 %v5983_v42 }
 0x801   : > { %4890 = vmatmul.mubr.msk.f32.gmra.mrb[52].mxu0 %vm3223_vm2, %v4013_v31 }
 0x802   : > { %4104 = vmatprep.mubr.f32.mxu0 %v5983_v42 }
 0x805   : > { %4891 = vmatmul.mubr.msk.f32.gmra.mrb[54].mxu0 %vm3223_vm2, %v4014_v59 }
 0x806   : > { %4110 = vmatprep.mubr.f32.mxu0 %v5983_v42 }
 0x809   : > { %4892 = vmatmul.mubr.msk.f32.gmra.mrb[56].mxu0 %vm3223_vm2, %v4015_v14 }
 0x80a   : > { %4193 = vmatprep.mubr.f32.mxu0 %v5983_v42 }
 0x8c0   : > { %v3977_v58 = vpop.f32.mrb[42].mxu0 }
 0x8c1   : > { %v3979_v38 = vpop.f32.mrb[43].mxu0  ;;  %v3978_v47 = vadd.f32 %v3977_v58, %v3882_v56 }
 0x8c2   : > { %v3980_v50 = vadd.f32 %v3979_v38, %v3882_v56 }
 0x8c3   : > { %v4000_v16 = vmax.f32 %v3978_v47, 0.0  ;;  %v4258_v47 = vld [vmem:[%s7354_s24] sm:$0xff] }
 0x8c4   : > { %v3983_v62 = vpop.f32.mrb[44].mxu0  ;;  %v4001_v0 = vmax.f32 %v3980_v50, 0.0  ;;  %v4263_v50 = vpop.permute.xlu0 %4262 }
 0x8c5   : > { %v3984_v15 = vadd.f32 %v3983_v62, %v3887_v11  ;;  %v3985_v29 = vpop.f32.mrb[45].mxu0 }
 0x8c6   : > { %v3986_v20 = vadd.f32 %v3985_v29, %v3887_v11 }
 0x8c7   : > { %v4002_v21 = vmax.f32 %v3984_v15, 0.0 }
 0x8c8   : > { %v4003_v1 = vmax.f32 %v3986_v20, 0.0  ;;  %v3989_v2 = vpop.f32.mrb[46].mxu0 }
 0x8c9   : > { %v5875_v60 = vpack.c.bf16 %v4002_v21, %v4000_v16  ;;  %v3991_v32 = vpop.f32.mrb[47].mxu0  ;;  %v3990_v7 = vadd.f32 %v3989_v2, %v3892_v8 }
 0x8ca   : > { %v5873_v6 = vpack.c.bf16 %v4003_v1, %v4001_v0  ;;  %v3992_v9 = vadd.f32 %v3991_v32, %v3892_v8 }
 0x8cb   : > { %v4004_v53 = vmax.f32 %v3990_v7, 0.0 }
 0x8cc   : > { %v3995_v12 = vpop.f32.mrb[48].mxu0  ;;  %5874 = vmatprep.subr.bf16.mxu0 %v5873_v6  ;;  %v4005_v23 = vmax.f32 %v3992_v9, 0.0 }
 0x8cd   : > { %v3996_v13 = vadd.f32 %v3995_v12, %v3897_v41  ;;  %v3997_v61 = vpop.f32.mrb[49].mxu0  ;;  %5876 = vmatpush1.bf16.msra.mxu0 %v5875_v60 }
 0x8ce   : > { %v3998_v17 = vadd.f32 %v3997_v61, %v3897_v41 }
 0x8cf   : > { %v4006_v63 = vmax.f32 %v3996_v13, 0.0 }
 0x8d0   : > { %v4007_v24 = vmax.f32 %v3998_v17, 0.0 }
 0x8d1   : > { %v5879_v25 = vpack.c.bf16 %v4006_v63, %v4004_v53 }
 0x8d2   : > { %v5877_v54 = vpack.c.bf16 %v4007_v24, %v4005_v23 }
 0x8d4   : > { %5878 = vmatprep.subr.bf16.mxu0 %v5877_v54 }
 0x8d5   : > { %5880 = vmatpush1.bf16.msra.mxu0 %v5879_v25 }
 0x8d8   : > { %4893 = vmatmul.mubr.msk.f32.vlgmr.msra.gmra.mrb[50].mxu0 %vm3223_vm2, %v4008_v28 }
 0x8d9   : > { %4199 = vmatprep.mubr.f32.mxu0 %v5983_v42 }
 0x8dc   : > { %4894 = vmatmul.mubr.msk.f32.gmra.mrb[52].mxu0 %vm3223_vm2, %v4009_v34 }
 0x8dd   : > { %4205 = vmatprep.mubr.f32.mxu0 %v5983_v42 }
 0x8e0   : > { %4895 = vmatmul.mubr.msk.f32.gmra.mrb[54].mxu0 %vm3223_vm2, %v4010_v36 }
 0x8e1   : > { %4211 = vmatprep.mubr.f32.mxu0 %v5983_v42 }
 0x8e4   : > { %4896 = vmatmul.mubr.msk.f32.gmra.mrb[56].mxu0 %vm3223_vm2, %v4011_v37 }
 0x8e5   : > { %4332 = vmatprep.mubr.f32.mxu0 %v5983_v42 }
 0x9ab   : > { %v4195_v35 = vpop.f32.mrb[50].mxu0 }
 0x9ac   : > { %v4242_v43 = vadd.f32 %v4225_v27, %v4195_v35  ;;  %v4197_v48 = vpop.f32.mrb[51].mxu0 }
 0x9ad   : > { %v4243_v3 = vadd.f32 %v4225_v27, %v4197_v48 }
 0x9ae   : > { %v4250_v49 = vmax.f32 %v4242_v43, 0.0 }
 0x9af   : > { %v4251_v4 = vmax.f32 %v4243_v3, 0.0  ;;  %v4201_v18 = vpop.f32.mrb[52].mxu0 }
 0x9b0   : > { %4339 = vst [vmem:[%s7308_s30] sm:$0xff] %v4250_v49  ;;  %v4244_v42 = vadd.f32 %v4230_v51, %v4201_v18  ;;  %v4203_v52 = vpop.f32.mrb[53].mxu0 }
 0x9b1   : > { %4340 = vst [vmem:[%s7308_s30 + $0x8] sm:$0xff] %v4251_v4  ;;  %v4245_v19 = vadd.f32 %v4230_v51, %v4203_v52 }
 0x9b2   : > { %v4252_v33 = vmax.f32 %v4244_v42, 0.0 }
 0x9b3   : > { %v4253_v45 = vmax.f32 %v4245_v19, 0.0  ;;  %v4207_v46 = vpop.f32.mrb[54].mxu0 }
 0x9b4   : > { %v5883_v22 = vpack.c.bf16 %v4252_v33, %v4250_v49  ;;  %4341 = vst [vmem:[%s7308_s30 + $0x10] sm:$0xff] %v4252_v33  ;;  %v4246_v26 = vadd.f32 %v4235_v5, %v4207_v46  ;;  %v4209_v57 = vpop.f32.mrb[55].mxu0 }
 0x9b5   : > { %v5881_v44 = vpack.c.bf16 %v4253_v45, %v4251_v4  ;;  %4342 = vst [vmem:[%s7308_s30 + $0x18] sm:$0xff] %v4253_v45  ;;  %v4247_v10 = vadd.f32 %v4235_v5, %v4209_v57 }
 0x9b6   : > { %v4254_v55 = vmax.f32 %v4246_v26, 0.0 }
 0x9b7   : > { %v4255_v40 = vmax.f32 %v4247_v10, 0.0  ;;  %v4213_v30 = vpop.f32.mrb[56].mxu0  ;;  %5882 = vmatprep.subr.bf16.mxu0 %v5881_v44 }
 0x9b8   : > { %4343 = vst [vmem:[%s7308_s30 + $0x20] sm:$0xff] %v4254_v55  ;;  %v4248_v31 = vadd.f32 %v4240_v39, %v4213_v30  ;;  %v4215_v59 = vpop.f32.mrb[57].mxu0  ;;  %5884 = vmatpush1.bf16.msra.mxu0 %v5883_v22 }
 0x9b9   : > { %4344 = vst [vmem:[%s7308_s30 + $0x28] sm:$0xff] %v4255_v40  ;;  %v4249_v14 = vadd.f32 %v4240_v39, %v4215_v59 }
 0x9ba   : > { %v4256_v56 = vmax.f32 %v4248_v31, 0.0 }
 0x9bb   : > { %v4257_v11 = vmax.f32 %v4249_v14, 0.0 }
 0x9bc   : > { %v5887_v58 = vpack.c.bf16 %v4256_v56, %v4254_v55  ;;  %4345 = vst [vmem:[%s7308_s30 + $0x30] sm:$0xff] %v4256_v56 }
 0x9bd   : > { %v5885_v38 = vpack.c.bf16 %v4257_v11, %v4255_v40  ;;  %4346 = vst [vmem:[%s7308_s30 + $0x38] sm:$0xff] %v4257_v11 }
 0x9bf   : > { %5886 = vmatprep.subr.bf16.mxu0 %v5885_v38 }
 0x9c0   : > { %5888 = vmatpush1.bf16.msra.mxu0 %v5887_v58 }
 0x9c3   : > { %4897 = vmatmul.mubr.msk.f32.vlgmr.msra.gmra.mrb[58].mxu0 %vm3223_vm2, %v4258_v47 }
 0xa96   : > { %v4334_v62 = vpop.f32.mrb[58].mxu0 }
 0xa97   : > { %v4335_v15 = vadd.f32 %v4334_v62, %v4263_v50  ;;  %v4336_v29 = vpop.f32.mrb[59].mxu0 }
 0xa98   : > { %v4337_v8 = vadd.f32 %v4336_v29, %v4263_v50 }
 0xa99   : > { %4347 = vst [vmem:[%s865_s12] sm:$0xff] %v4335_v15 }
 0xa9a   : > { %4348 = vst [vmem:[%s865_s12 + $0x8] sm:$0xff] %v4337_v8 }
 0xa9b PF: > { %s39_s8 = sadd.s32 1, %s5980_s8  }
 0xa9c   : > { %p36_p4 = scmp.ge.s32.totalorder %s39_s8, 4  }
 0xa9e   :  { %38 = sbr.rel (!%p36_p4) target bundleno = 14 (0xe), region = 186 }

</bundles_post_ra>
